<compile_context>
chip_gen: v6e
topology: v6e:2x2x1
jax: 0.10.0
libtpu: 0.0.40
codegen_flags: <defaults>
</compile_context>

<pallas_src>
import functools

import jax
import jax.numpy as jnp
from jax import lax
from jax.experimental import pallas as pl
from jax.experimental.pallas import tpu as pltpu


def _sepconv_kernel(x_ref, wd_ref, bd_ref, wp_ref, bp_ref, o_ref,
                    *, K, Cin, Cout, Hout, Wout, block_n):
    # x_ref:  (block_n, Cin, H, W)   VMEM, native NCHW (no channel padding)
    # wd_ref: (K*K*Cin,)   SMEM f32  depthwise weights, BN1 scale folded in
    # bd_ref: (Cin,)       SMEM f32  folded depthwise bias (bd*s1 + b1)
    # wp_ref: (Cin*Cout,)  SMEM f32  pointwise weights, BN2 scale folded in
    # bp_ref: (Cout,)      SMEM f32  folded pointwise bias (bp*s2 + b2)
    # o_ref:  (block_n, Cout, Hout, Wout)
    for n in range(block_n):          # small static batch block; unrolled
        # ---- depthwise KxK conv (stride 1, VALID) + BN1 + ReLU, per input
        #      channel plane.  Taps are read straight from the ref (cheap VMEM
        #      re-reads); the accumulator starts from the first tap product.
        z = []
        for c in range(Cin):
            acc = None
            for kh in range(K):
                for kw in range(K):
                    tap = x_ref[n, c, kh:kh + Hout, kw:kw + Wout]
                    term = tap * wd_ref[(kh * K + kw) * Cin + c]
                    acc = term if acc is None else acc + term
            z.append(jnp.maximum(acc + bd_ref[c], 0.0))
        # ---- pointwise 1x1 conv + BN2 + ReLU: Cin scalar MACs per output
        #      channel on the VPU (channels are tiny, so no MXU / no padding).
        for o in range(Cout):
            y = None
            for c in range(Cin):
                t = z[c] * wp_ref[c * Cout + o]
                y = t if y is None else y + t
            o_ref[n, o] = jnp.maximum(y + bp_ref[o], 0.0).astype(o_ref.dtype)


def basic_separable_conv(x_nchw, params, kernel_size, *, block_n=1):
    """x_nchw: (N, Cin, H, W) float32. Returns (N, Cout, Hout, Wout)."""
    wd, bd, s1, b1, wp, bp, s2, b2 = params
    N, Cin, H, W = x_nchw.shape
    K = kernel_size
    Hout, Wout = H - K + 1, W - K + 1
    Cout = wp.shape[1]

    # ---- fold BN (inference mode) into the conv weights, once, on host ----
    #   z = (dwconv(x, wd) + bd) * s1 + b1 == dwconv(x, wd*s1) + (bd*s1 + b1)
    #   y = (z @ wp + bp) * s2 + b2        == z @ (wp*s2) + (bp*s2 + b2)
    # Flattened 1-D f32 tables -> SMEM, read as scalars inside the kernel.
    wd_f = (wd * s1[0]).reshape(-1)          # (K*K*Cin,), index (kh*K+kw)*Cin+c
    bd_f = (bd * s1 + b1).reshape(-1)        # (Cin,)
    wp_f = (wp * s2).reshape(-1)             # (Cin*Cout,), index c*Cout+o
    bp_f = (bp * s2 + b2).reshape(-1)        # (Cout,)

    # Pad only the batch axis (if needed) so block_n divides it.  No channel
    # padding, no transposes: the kernel consumes/produces NCHW directly.
    n_pad = (-N) % block_n
    x = jnp.pad(x_nchw, ((0, n_pad), (0, 0), (0, 0), (0, 0))) if n_pad else x_nchw
    n_blocks = x.shape[0] // block_n

    kernel = functools.partial(_sepconv_kernel, K=K, Cin=Cin, Cout=Cout,
                               Hout=Hout, Wout=Wout, block_n=block_n)
    smem = pl.BlockSpec(memory_space=pltpu.MemorySpace.SMEM)

    out = pl.pallas_call(
        kernel,
        out_shape=jax.ShapeDtypeStruct((x.shape[0], Cout, Hout, Wout),
                                       x.dtype),
        grid_spec=pltpu.PrefetchScalarGridSpec(
            num_scalar_prefetch=0,
            grid=(n_blocks,),
            in_specs=[
                pl.BlockSpec((block_n, Cin, H, W),
                             lambda n: (n, 0, 0, 0)),     # x block (NCHW)
                smem,                                      # folded dw weights
                smem,                                      # folded dw bias
                smem,                                      # folded pw weights
                smem,                                      # folded pw bias
            ],
            out_specs=pl.BlockSpec((block_n, Cout, Hout, Wout),
                                   lambda n: (n, 0, 0, 0)),
        ),
        compiler_params=pltpu.CompilerParams(
            dimension_semantics=("parallel",),
            vmem_limit_bytes=32 * 1024 * 1024),
    )(x, wd_f, bd_f, wp_f, bp_f)

    return out[:N] if n_pad else out


def make_params(key, in_channel, out_channel, kernel_size, eps=1e-5):
    ks = jax.random.split(key, 10)
    K = kernel_size
    # depthwise conv: PyTorch weight (Cin, 1, K, K) -> layout (K, K, Cin)
    wd = 0.1 * jax.random.normal(ks[0], (K, K, in_channel), jnp.float32)
    bd = 0.1 * jax.random.normal(ks[1], (1, in_channel), jnp.float32)
    # BN1 (inference): fold gamma/beta/running stats into scale/bias
    g1 = 1.0 + 0.1 * jax.random.normal(ks[2], (in_channel,), jnp.float32)
    be1 = 0.1 * jax.random.normal(ks[3], (in_channel,), jnp.float32)
    m1 = 0.05 * jax.random.normal(ks[4], (in_channel,), jnp.float32)
    v1 = 1.0 + 0.1 * jax.nn.sigmoid(jax.random.normal(ks[5], (in_channel,)))
    s1 = (g1 / jnp.sqrt(v1 + eps)).reshape(1, in_channel)
    b1 = (be1 - m1 * g1 / jnp.sqrt(v1 + eps)).reshape(1, in_channel)
    # pointwise conv: PyTorch weight (Cout, Cin, 1, 1) -> layout (Cin, Cout)
    wp = 0.1 * jax.random.normal(ks[6], (in_channel, out_channel), jnp.float32)
    bp = 0.1 * jax.random.normal(ks[7], (1, out_channel), jnp.float32)
    # BN2
    g2 = 1.0 + 0.1 * jax.random.normal(ks[8], (out_channel,), jnp.float32)
    be2 = 0.05 * jax.random.normal(ks[9], (out_channel,), jnp.float32)
    m2 = jnp.linspace(-0.1, 0.1, out_channel, dtype=jnp.float32)
    v2 = jnp.linspace(0.9, 1.1, out_channel, dtype=jnp.float32)
    s2 = (g2 / jnp.sqrt(v2 + eps)).reshape(1, out_channel)
    b2 = (be2 - m2 * g2 / jnp.sqrt(v2 + eps)).reshape(1, out_channel)
    return (wd, bd, s1, b1, wp, bp, s2, b2)


def reference(x_nchw, params, kernel_size):
    """Pure-JAX NCHW reference mirroring the PyTorch module (eval-mode BN)."""
    wd, bd, s1, b1, wp, bp, s2, b2 = params
    Cin = x_nchw.shape[1]
    Cout = wp.shape[1]
    # depthwise: lax conv with feature_group_count=Cin, weight (Cin, 1, K, K)
    wd_oihw = jnp.transpose(wd, (2, 0, 1))[:, None, :, :]
    z = lax.conv_general_dilated(
        x_nchw, wd_oihw, window_strides=(1, 1), padding='VALID',
        dimension_numbers=('NCHW', 'OIHW', 'NCHW'), feature_group_count=Cin)
    z = z + bd.reshape(1, Cin, 1, 1)
    z = z * s1.reshape(1, Cin, 1, 1) + b1.reshape(1, Cin, 1, 1)
    z = jnp.maximum(z, 0.0)
    wp_oihw = jnp.transpose(wp, (1, 0))[:, :, None, None]
    y = lax.conv_general_dilated(
        z, wp_oihw, window_strides=(1, 1), padding='VALID',
        dimension_numbers=('NCHW', 'OIHW', 'NCHW'))
    y = y + bp.reshape(1, Cout, 1, 1)
    y = y * s2.reshape(1, Cout, 1, 1) + b2.reshape(1, Cout, 1, 1)
    return jnp.maximum(y, 0.0)


if __name__ == "__main__":
    key = jax.random.PRNGKey(0)
    kx, kp = jax.random.split(key)

    N, Cin, H, W = 2, 4, 16, 16
    Cout, K = 8, 3

    x = jax.random.normal(kx, (N, Cin, H, W), jnp.float32)
    params = make_params(kp, Cin, Cout, K)

    out = basic_separable_conv(x, params, K, block_n=1)
    out = jax.block_until_ready(out)

    ref = jax.block_until_ready(reference(x, params, K))
    assert out.shape == (N, Cout, H - K + 1, W - K + 1), out.shape
    assert jnp.allclose(out, ref, atol=1e-4, rtol=1e-4), (
        float(jnp.max(jnp.abs(out - ref))))

    print("KERNEL_OK")
</pallas_src>

<mosaic_0001>
module attributes {stable_mosaic.version = 11 : i64} {
  func.func @_sepconv_kernel(%arg0: i32, %arg1: memref<1x4x16x16xf32, #tpu.memory_space<vmem>>, %arg2: memref<36xf32, #tpu.memory_space<smem>>, %arg3: memref<4xf32, #tpu.memory_space<smem>>, %arg4: memref<32xf32, #tpu.memory_space<smem>>, %arg5: memref<8xf32, #tpu.memory_space<smem>>, %arg6: memref<1x8x14x14xf32, #tpu.memory_space<vmem>>) attributes {dimension_semantics = [#tpu.dimension_semantics<parallel>], iteration_bounds = array<i64: 2>, scalar_prefetch = 0 : i64, scratch_operands = 0 : i64, tpu.core_type = #tpu.core_type<tc>, window_params = [{transform_indices = @transform_0, window_bounds = array<i64: 1, 4, 16, 16>}, {transform_indices = @transform_1, window_bounds = array<i64: 36>}, {transform_indices = @transform_2, window_bounds = array<i64: 4>}, {transform_indices = @transform_3, window_bounds = array<i64: 32>}, {transform_indices = @transform_4, window_bounds = array<i64: 8>}, {transform_indices = @transform_5, window_bounds = array<i64: 1, 8, 14, 14>}]} {
    %c0 = arith.constant 0 : index
    %c0_0 = arith.constant 0 : index
    %c0_1 = arith.constant 0 : index
    %c0_2 = arith.constant 0 : index
    %0 = vector.load %arg1[%c0, %c0_0, %c0_1, %c0_2] : memref<1x4x16x16xf32, #tpu.memory_space<vmem>>, vector<1x1x14x14xf32>
    %1 = vector.shape_cast %0 : vector<1x1x14x14xf32> to vector<14x14xf32>
    %c0_3 = arith.constant 0 : index
    %2 = memref.load %arg2[%c0_3] : memref<36xf32, #tpu.memory_space<smem>>
    %3 = vector.broadcast %2 : f32 to vector<14x14xf32>
    %4 = arith.mulf %1, %3 : vector<14x14xf32>
    %c0_4 = arith.constant 0 : index
    %c0_5 = arith.constant 0 : index
    %c0_6 = arith.constant 0 : index
    %c1 = arith.constant 1 : index
    %5 = vector.load %arg1[%c0_4, %c0_5, %c0_6, %c1] : memref<1x4x16x16xf32, #tpu.memory_space<vmem>>, vector<1x1x14x14xf32>
    %6 = vector.shape_cast %5 : vector<1x1x14x14xf32> to vector<14x14xf32>
    %c4 = arith.constant 4 : index
    %7 = memref.load %arg2[%c4] : memref<36xf32, #tpu.memory_space<smem>>
    %8 = vector.broadcast %7 : f32 to vector<14x14xf32>
    %9 = arith.mulf %6, %8 : vector<14x14xf32>
    %10 = arith.addf %4, %9 : vector<14x14xf32>
    %c0_7 = arith.constant 0 : index
    %c0_8 = arith.constant 0 : index
    %c0_9 = arith.constant 0 : index
    %c2 = arith.constant 2 : index
    %11 = vector.load %arg1[%c0_7, %c0_8, %c0_9, %c2] : memref<1x4x16x16xf32, #tpu.memory_space<vmem>>, vector<1x1x14x14xf32>
    %12 = vector.shape_cast %11 : vector<1x1x14x14xf32> to vector<14x14xf32>
    %c8 = arith.constant 8 : index
    %13 = memref.load %arg2[%c8] : memref<36xf32, #tpu.memory_space<smem>>
    %14 = vector.broadcast %13 : f32 to vector<14x14xf32>
    %15 = arith.mulf %12, %14 : vector<14x14xf32>
    %16 = arith.addf %10, %15 : vector<14x14xf32>
    %c0_10 = arith.constant 0 : index
    %c0_11 = arith.constant 0 : index
    %c1_12 = arith.constant 1 : index
    %c0_13 = arith.constant 0 : index
    %17 = vector.load %arg1[%c0_10, %c0_11, %c1_12, %c0_13] : memref<1x4x16x16xf32, #tpu.memory_space<vmem>>, vector<1x1x14x14xf32>
    %18 = vector.shape_cast %17 : vector<1x1x14x14xf32> to vector<14x14xf32>
    %c12 = arith.constant 12 : index
    %19 = memref.load %arg2[%c12] : memref<36xf32, #tpu.memory_space<smem>>
    %20 = vector.broadcast %19 : f32 to vector<14x14xf32>
    %21 = arith.mulf %18, %20 : vector<14x14xf32>
    %22 = arith.addf %16, %21 : vector<14x14xf32>
    %c0_14 = arith.constant 0 : index
    %c0_15 = arith.constant 0 : index
    %c1_16 = arith.constant 1 : index
    %c1_17 = arith.constant 1 : index
    %23 = vector.load %arg1[%c0_14, %c0_15, %c1_16, %c1_17] : memref<1x4x16x16xf32, #tpu.memory_space<vmem>>, vector<1x1x14x14xf32>
    %24 = vector.shape_cast %23 : vector<1x1x14x14xf32> to vector<14x14xf32>
    %c16 = arith.constant 16 : index
    %25 = memref.load %arg2[%c16] : memref<36xf32, #tpu.memory_space<smem>>
    %26 = vector.broadcast %25 : f32 to vector<14x14xf32>
    %27 = arith.mulf %24, %26 : vector<14x14xf32>
    %28 = arith.addf %22, %27 : vector<14x14xf32>
    %c0_18 = arith.constant 0 : index
    %c0_19 = arith.constant 0 : index
    %c1_20 = arith.constant 1 : index
    %c2_21 = arith.constant 2 : index
    %29 = vector.load %arg1[%c0_18, %c0_19, %c1_20, %c2_21] : memref<1x4x16x16xf32, #tpu.memory_space<vmem>>, vector<1x1x14x14xf32>
    %30 = vector.shape_cast %29 : vector<1x1x14x14xf32> to vector<14x14xf32>
    %c20 = arith.constant 20 : index
    %31 = memref.load %arg2[%c20] : memref<36xf32, #tpu.memory_space<smem>>
    %32 = vector.broadcast %31 : f32 to vector<14x14xf32>
    %33 = arith.mulf %30, %32 : vector<14x14xf32>
    %34 = arith.addf %28, %33 : vector<14x14xf32>
    %c0_22 = arith.constant 0 : index
    %c0_23 = arith.constant 0 : index
    %c2_24 = arith.constant 2 : index
    %c0_25 = arith.constant 0 : index
    %35 = vector.load %arg1[%c0_22, %c0_23, %c2_24, %c0_25] : memref<1x4x16x16xf32, #tpu.memory_space<vmem>>, vector<1x1x14x14xf32>
    %36 = vector.shape_cast %35 : vector<1x1x14x14xf32> to vector<14x14xf32>
    %c24 = arith.constant 24 : index
    %37 = memref.load %arg2[%c24] : memref<36xf32, #tpu.memory_space<smem>>
    %38 = vector.broadcast %37 : f32 to vector<14x14xf32>
    %39 = arith.mulf %36, %38 : vector<14x14xf32>
    %40 = arith.addf %34, %39 : vector<14x14xf32>
    %c0_26 = arith.constant 0 : index
    %c0_27 = arith.constant 0 : index
    %c2_28 = arith.constant 2 : index
    %c1_29 = arith.constant 1 : index
    %41 = vector.load %arg1[%c0_26, %c0_27, %c2_28, %c1_29] : memref<1x4x16x16xf32, #tpu.memory_space<vmem>>, vector<1x1x14x14xf32>
    %42 = vector.shape_cast %41 : vector<1x1x14x14xf32> to vector<14x14xf32>
    %c28 = arith.constant 28 : index
    %43 = memref.load %arg2[%c28] : memref<36xf32, #tpu.memory_space<smem>>
    %44 = vector.broadcast %43 : f32 to vector<14x14xf32>
    %45 = arith.mulf %42, %44 : vector<14x14xf32>
    %46 = arith.addf %40, %45 : vector<14x14xf32>
    %c0_30 = arith.constant 0 : index
    %c0_31 = arith.constant 0 : index
    %c2_32 = arith.constant 2 : index
    %c2_33 = arith.constant 2 : index
    %47 = vector.load %arg1[%c0_30, %c0_31, %c2_32, %c2_33] : memref<1x4x16x16xf32, #tpu.memory_space<vmem>>, vector<1x1x14x14xf32>
    %48 = vector.shape_cast %47 : vector<1x1x14x14xf32> to vector<14x14xf32>
    %c32 = arith.constant 32 : index
    %49 = memref.load %arg2[%c32] : memref<36xf32, #tpu.memory_space<smem>>
    %50 = vector.broadcast %49 : f32 to vector<14x14xf32>
    %51 = arith.mulf %48, %50 : vector<14x14xf32>
    %52 = arith.addf %46, %51 : vector<14x14xf32>
    %c0_34 = arith.constant 0 : index
    %53 = memref.load %arg3[%c0_34] : memref<4xf32, #tpu.memory_space<smem>>
    %54 = vector.broadcast %53 : f32 to vector<14x14xf32>
    %55 = arith.addf %52, %54 : vector<14x14xf32>
    %cst = arith.constant 0.000000e+00 : f32
    %56 = vector.broadcast %cst : f32 to vector<14x14xf32>
    %57 = arith.maximumf %55, %56 : vector<14x14xf32>
    %c0_35 = arith.constant 0 : index
    %c1_36 = arith.constant 1 : index
    %c0_37 = arith.constant 0 : index
    %c0_38 = arith.constant 0 : index
    %58 = vector.load %arg1[%c0_35, %c1_36, %c0_37, %c0_38] : memref<1x4x16x16xf32, #tpu.memory_space<vmem>>, vector<1x1x14x14xf32>
    %59 = vector.shape_cast %58 : vector<1x1x14x14xf32> to vector<14x14xf32>
    %c1_39 = arith.constant 1 : index
    %60 = memref.load %arg2[%c1_39] : memref<36xf32, #tpu.memory_space<smem>>
    %61 = vector.broadcast %60 : f32 to vector<14x14xf32>
    %62 = arith.mulf %59, %61 : vector<14x14xf32>
    %c0_40 = arith.constant 0 : index
    %c1_41 = arith.constant 1 : index
    %c0_42 = arith.constant 0 : index
    %c1_43 = arith.constant 1 : index
    %63 = vector.load %arg1[%c0_40, %c1_41, %c0_42, %c1_43] : memref<1x4x16x16xf32, #tpu.memory_space<vmem>>, vector<1x1x14x14xf32>
    %64 = vector.shape_cast %63 : vector<1x1x14x14xf32> to vector<14x14xf32>
    %c5 = arith.constant 5 : index
    %65 = memref.load %arg2[%c5] : memref<36xf32, #tpu.memory_space<smem>>
    %66 = vector.broadcast %65 : f32 to vector<14x14xf32>
    %67 = arith.mulf %64, %66 : vector<14x14xf32>
    %68 = arith.addf %62, %67 : vector<14x14xf32>
    %c0_44 = arith.constant 0 : index
    %c1_45 = arith.constant 1 : index
    %c0_46 = arith.constant 0 : index
    %c2_47 = arith.constant 2 : index
    %69 = vector.load %arg1[%c0_44, %c1_45, %c0_46, %c2_47] : memref<1x4x16x16xf32, #tpu.memory_space<vmem>>, vector<1x1x14x14xf32>
    %70 = vector.shape_cast %69 : vector<1x1x14x14xf32> to vector<14x14xf32>
    %c9 = arith.constant 9 : index
    %71 = memref.load %arg2[%c9] : memref<36xf32, #tpu.memory_space<smem>>
    %72 = vector.broadcast %71 : f32 to vector<14x14xf32>
    %73 = arith.mulf %70, %72 : vector<14x14xf32>
    %74 = arith.addf %68, %73 : vector<14x14xf32>
    %c0_48 = arith.constant 0 : index
    %c1_49 = arith.constant 1 : index
    %c1_50 = arith.constant 1 : index
    %c0_51 = arith.constant 0 : index
    %75 = vector.load %arg1[%c0_48, %c1_49, %c1_50, %c0_51] : memref<1x4x16x16xf32, #tpu.memory_space<vmem>>, vector<1x1x14x14xf32>
    %76 = vector.shape_cast %75 : vector<1x1x14x14xf32> to vector<14x14xf32>
    %c13 = arith.constant 13 : index
    %77 = memref.load %arg2[%c13] : memref<36xf32, #tpu.memory_space<smem>>
    %78 = vector.broadcast %77 : f32 to vector<14x14xf32>
    %79 = arith.mulf %76, %78 : vector<14x14xf32>
    %80 = arith.addf %74, %79 : vector<14x14xf32>
    %c0_52 = arith.constant 0 : index
    %c1_53 = arith.constant 1 : index
    %c1_54 = arith.constant 1 : index
    %c1_55 = arith.constant 1 : index
    %81 = vector.load %arg1[%c0_52, %c1_53, %c1_54, %c1_55] : memref<1x4x16x16xf32, #tpu.memory_space<vmem>>, vector<1x1x14x14xf32>
    %82 = vector.shape_cast %81 : vector<1x1x14x14xf32> to vector<14x14xf32>
    %c17 = arith.constant 17 : index
    %83 = memref.load %arg2[%c17] : memref<36xf32, #tpu.memory_space<smem>>
    %84 = vector.broadcast %83 : f32 to vector<14x14xf32>
    %85 = arith.mulf %82, %84 : vector<14x14xf32>
    %86 = arith.addf %80, %85 : vector<14x14xf32>
    %c0_56 = arith.constant 0 : index
    %c1_57 = arith.constant 1 : index
    %c1_58 = arith.constant 1 : index
    %c2_59 = arith.constant 2 : index
    %87 = vector.load %arg1[%c0_56, %c1_57, %c1_58, %c2_59] : memref<1x4x16x16xf32, #tpu.memory_space<vmem>>, vector<1x1x14x14xf32>
    %88 = vector.shape_cast %87 : vector<1x1x14x14xf32> to vector<14x14xf32>
    %c21 = arith.constant 21 : index
    %89 = memref.load %arg2[%c21] : memref<36xf32, #tpu.memory_space<smem>>
    %90 = vector.broadcast %89 : f32 to vector<14x14xf32>
    %91 = arith.mulf %88, %90 : vector<14x14xf32>
    %92 = arith.addf %86, %91 : vector<14x14xf32>
    %c0_60 = arith.constant 0 : index
    %c1_61 = arith.constant 1 : index
    %c2_62 = arith.constant 2 : index
    %c0_63 = arith.constant 0 : index
    %93 = vector.load %arg1[%c0_60, %c1_61, %c2_62, %c0_63] : memref<1x4x16x16xf32, #tpu.memory_space<vmem>>, vector<1x1x14x14xf32>
    %94 = vector.shape_cast %93 : vector<1x1x14x14xf32> to vector<14x14xf32>
    %c25 = arith.constant 25 : index
    %95 = memref.load %arg2[%c25] : memref<36xf32, #tpu.memory_space<smem>>
    %96 = vector.broadcast %95 : f32 to vector<14x14xf32>
    %97 = arith.mulf %94, %96 : vector<14x14xf32>
    %98 = arith.addf %92, %97 : vector<14x14xf32>
    %c0_64 = arith.constant 0 : index
    %c1_65 = arith.constant 1 : index
    %c2_66 = arith.constant 2 : index
    %c1_67 = arith.constant 1 : index
    %99 = vector.load %arg1[%c0_64, %c1_65, %c2_66, %c1_67] : memref<1x4x16x16xf32, #tpu.memory_space<vmem>>, vector<1x1x14x14xf32>
    %100 = vector.shape_cast %99 : vector<1x1x14x14xf32> to vector<14x14xf32>
    %c29 = arith.constant 29 : index
    %101 = memref.load %arg2[%c29] : memref<36xf32, #tpu.memory_space<smem>>
    %102 = vector.broadcast %101 : f32 to vector<14x14xf32>
    %103 = arith.mulf %100, %102 : vector<14x14xf32>
    %104 = arith.addf %98, %103 : vector<14x14xf32>
    %c0_68 = arith.constant 0 : index
    %c1_69 = arith.constant 1 : index
    %c2_70 = arith.constant 2 : index
    %c2_71 = arith.constant 2 : index
    %105 = vector.load %arg1[%c0_68, %c1_69, %c2_70, %c2_71] : memref<1x4x16x16xf32, #tpu.memory_space<vmem>>, vector<1x1x14x14xf32>
    %106 = vector.shape_cast %105 : vector<1x1x14x14xf32> to vector<14x14xf32>
    %c33 = arith.constant 33 : index
    %107 = memref.load %arg2[%c33] : memref<36xf32, #tpu.memory_space<smem>>
    %108 = vector.broadcast %107 : f32 to vector<14x14xf32>
    %109 = arith.mulf %106, %108 : vector<14x14xf32>
    %110 = arith.addf %104, %109 : vector<14x14xf32>
    %c1_72 = arith.constant 1 : index
    %111 = memref.load %arg3[%c1_72] : memref<4xf32, #tpu.memory_space<smem>>
    %112 = vector.broadcast %111 : f32 to vector<14x14xf32>
    %113 = arith.addf %110, %112 : vector<14x14xf32>
    %cst_73 = arith.constant 0.000000e+00 : f32
    %114 = vector.broadcast %cst_73 : f32 to vector<14x14xf32>
    %115 = arith.maximumf %113, %114 : vector<14x14xf32>
    %c0_74 = arith.constant 0 : index
    %c2_75 = arith.constant 2 : index
    %c0_76 = arith.constant 0 : index
    %c0_77 = arith.constant 0 : index
    %116 = vector.load %arg1[%c0_74, %c2_75, %c0_76, %c0_77] : memref<1x4x16x16xf32, #tpu.memory_space<vmem>>, vector<1x1x14x14xf32>
    %117 = vector.shape_cast %116 : vector<1x1x14x14xf32> to vector<14x14xf32>
    %c2_78 = arith.constant 2 : index
    %118 = memref.load %arg2[%c2_78] : memref<36xf32, #tpu.memory_space<smem>>
    %119 = vector.broadcast %118 : f32 to vector<14x14xf32>
    %120 = arith.mulf %117, %119 : vector<14x14xf32>
    %c0_79 = arith.constant 0 : index
    %c2_80 = arith.constant 2 : index
    %c0_81 = arith.constant 0 : index
    %c1_82 = arith.constant 1 : index
    %121 = vector.load %arg1[%c0_79, %c2_80, %c0_81, %c1_82] : memref<1x4x16x16xf32, #tpu.memory_space<vmem>>, vector<1x1x14x14xf32>
    %122 = vector.shape_cast %121 : vector<1x1x14x14xf32> to vector<14x14xf32>
    %c6 = arith.constant 6 : index
    %123 = memref.load %arg2[%c6] : memref<36xf32, #tpu.memory_space<smem>>
    %124 = vector.broadcast %123 : f32 to vector<14x14xf32>
    %125 = arith.mulf %122, %124 : vector<14x14xf32>
    %126 = arith.addf %120, %125 : vector<14x14xf32>
    %c0_83 = arith.constant 0 : index
    %c2_84 = arith.constant 2 : index
    %c0_85 = arith.constant 0 : index
    %c2_86 = arith.constant 2 : index
    %127 = vector.load %arg1[%c0_83, %c2_84, %c0_85, %c2_86] : memref<1x4x16x16xf32, #tpu.memory_space<vmem>>, vector<1x1x14x14xf32>
    %128 = vector.shape_cast %127 : vector<1x1x14x14xf32> to vector<14x14xf32>
    %c10 = arith.constant 10 : index
    %129 = memref.load %arg2[%c10] : memref<36xf32, #tpu.memory_space<smem>>
    %130 = vector.broadcast %129 : f32 to vector<14x14xf32>
    %131 = arith.mulf %128, %130 : vector<14x14xf32>
    %132 = arith.addf %126, %131 : vector<14x14xf32>
    %c0_87 = arith.constant 0 : index
    %c2_88 = arith.constant 2 : index
    %c1_89 = arith.constant 1 : index
    %c0_90 = arith.constant 0 : index
    %133 = vector.load %arg1[%c0_87, %c2_88, %c1_89, %c0_90] : memref<1x4x16x16xf32, #tpu.memory_space<vmem>>, vector<1x1x14x14xf32>
    %134 = vector.shape_cast %133 : vector<1x1x14x14xf32> to vector<14x14xf32>
    %c14 = arith.constant 14 : index
    %135 = memref.load %arg2[%c14] : memref<36xf32, #tpu.memory_space<smem>>
    %136 = vector.broadcast %135 : f32 to vector<14x14xf32>
    %137 = arith.mulf %134, %136 : vector<14x14xf32>
    %138 = arith.addf %132, %137 : vector<14x14xf32>
    %c0_91 = arith.constant 0 : index
    %c2_92 = arith.constant 2 : index
    %c1_93 = arith.constant 1 : index
    %c1_94 = arith.constant 1 : index
    %139 = vector.load %arg1[%c0_91, %c2_92, %c1_93, %c1_94] : memref<1x4x16x16xf32, #tpu.memory_space<vmem>>, vector<1x1x14x14xf32>
    %140 = vector.shape_cast %139 : vector<1x1x14x14xf32> to vector<14x14xf32>
    %c18 = arith.constant 18 : index
    %141 = memref.load %arg2[%c18] : memref<36xf32, #tpu.memory_space<smem>>
    %142 = vector.broadcast %141 : f32 to vector<14x14xf32>
    %143 = arith.mulf %140, %142 : vector<14x14xf32>
    %144 = arith.addf %138, %143 : vector<14x14xf32>
    %c0_95 = arith.constant 0 : index
    %c2_96 = arith.constant 2 : index
    %c1_97 = arith.constant 1 : index
    %c2_98 = arith.constant 2 : index
    %145 = vector.load %arg1[%c0_95, %c2_96, %c1_97, %c2_98] : memref<1x4x16x16xf32, #tpu.memory_space<vmem>>, vector<1x1x14x14xf32>
    %146 = vector.shape_cast %145 : vector<1x1x14x14xf32> to vector<14x14xf32>
    %c22 = arith.constant 22 : index
    %147 = memref.load %arg2[%c22] : memref<36xf32, #tpu.memory_space<smem>>
    %148 = vector.broadcast %147 : f32 to vector<14x14xf32>
    %149 = arith.mulf %146, %148 : vector<14x14xf32>
    %150 = arith.addf %144, %149 : vector<14x14xf32>
    %c0_99 = arith.constant 0 : index
    %c2_100 = arith.constant 2 : index
    %c2_101 = arith.constant 2 : index
    %c0_102 = arith.constant 0 : index
    %151 = vector.load %arg1[%c0_99, %c2_100, %c2_101, %c0_102] : memref<1x4x16x16xf32, #tpu.memory_space<vmem>>, vector<1x1x14x14xf32>
    %152 = vector.shape_cast %151 : vector<1x1x14x14xf32> to vector<14x14xf32>
    %c26 = arith.constant 26 : index
    %153 = memref.load %arg2[%c26] : memref<36xf32, #tpu.memory_space<smem>>
    %154 = vector.broadcast %153 : f32 to vector<14x14xf32>
    %155 = arith.mulf %152, %154 : vector<14x14xf32>
    %156 = arith.addf %150, %155 : vector<14x14xf32>
    %c0_103 = arith.constant 0 : index
    %c2_104 = arith.constant 2 : index
    %c2_105 = arith.constant 2 : index
    %c1_106 = arith.constant 1 : index
    %157 = vector.load %arg1[%c0_103, %c2_104, %c2_105, %c1_106] : memref<1x4x16x16xf32, #tpu.memory_space<vmem>>, vector<1x1x14x14xf32>
    %158 = vector.shape_cast %157 : vector<1x1x14x14xf32> to vector<14x14xf32>
    %c30 = arith.constant 30 : index
    %159 = memref.load %arg2[%c30] : memref<36xf32, #tpu.memory_space<smem>>
    %160 = vector.broadcast %159 : f32 to vector<14x14xf32>
    %161 = arith.mulf %158, %160 : vector<14x14xf32>
    %162 = arith.addf %156, %161 : vector<14x14xf32>
    %c0_107 = arith.constant 0 : index
    %c2_108 = arith.constant 2 : index
    %c2_109 = arith.constant 2 : index
    %c2_110 = arith.constant 2 : index
    %163 = vector.load %arg1[%c0_107, %c2_108, %c2_109, %c2_110] : memref<1x4x16x16xf32, #tpu.memory_space<vmem>>, vector<1x1x14x14xf32>
    %164 = vector.shape_cast %163 : vector<1x1x14x14xf32> to vector<14x14xf32>
    %c34 = arith.constant 34 : index
    %165 = memref.load %arg2[%c34] : memref<36xf32, #tpu.memory_space<smem>>
    %166 = vector.broadcast %165 : f32 to vector<14x14xf32>
    %167 = arith.mulf %164, %166 : vector<14x14xf32>
    %168 = arith.addf %162, %167 : vector<14x14xf32>
    %c2_111 = arith.constant 2 : index
    %169 = memref.load %arg3[%c2_111] : memref<4xf32, #tpu.memory_space<smem>>
    %170 = vector.broadcast %169 : f32 to vector<14x14xf32>
    %171 = arith.addf %168, %170 : vector<14x14xf32>
    %cst_112 = arith.constant 0.000000e+00 : f32
    %172 = vector.broadcast %cst_112 : f32 to vector<14x14xf32>
    %173 = arith.maximumf %171, %172 : vector<14x14xf32>
    %c0_113 = arith.constant 0 : index
    %c3 = arith.constant 3 : index
    %c0_114 = arith.constant 0 : index
    %c0_115 = arith.constant 0 : index
    %174 = vector.load %arg1[%c0_113, %c3, %c0_114, %c0_115] : memref<1x4x16x16xf32, #tpu.memory_space<vmem>>, vector<1x1x14x14xf32>
    %175 = vector.shape_cast %174 : vector<1x1x14x14xf32> to vector<14x14xf32>
    %c3_116 = arith.constant 3 : index
    %176 = memref.load %arg2[%c3_116] : memref<36xf32, #tpu.memory_space<smem>>
    %177 = vector.broadcast %176 : f32 to vector<14x14xf32>
    %178 = arith.mulf %175, %177 : vector<14x14xf32>
    %c0_117 = arith.constant 0 : index
    %c3_118 = arith.constant 3 : index
    %c0_119 = arith.constant 0 : index
    %c1_120 = arith.constant 1 : index
    %179 = vector.load %arg1[%c0_117, %c3_118, %c0_119, %c1_120] : memref<1x4x16x16xf32, #tpu.memory_space<vmem>>, vector<1x1x14x14xf32>
    %180 = vector.shape_cast %179 : vector<1x1x14x14xf32> to vector<14x14xf32>
    %c7 = arith.constant 7 : index
    %181 = memref.load %arg2[%c7] : memref<36xf32, #tpu.memory_space<smem>>
    %182 = vector.broadcast %181 : f32 to vector<14x14xf32>
    %183 = arith.mulf %180, %182 : vector<14x14xf32>
    %184 = arith.addf %178, %183 : vector<14x14xf32>
    %c0_121 = arith.constant 0 : index
    %c3_122 = arith.constant 3 : index
    %c0_123 = arith.constant 0 : index
    %c2_124 = arith.constant 2 : index
    %185 = vector.load %arg1[%c0_121, %c3_122, %c0_123, %c2_124] : memref<1x4x16x16xf32, #tpu.memory_space<vmem>>, vector<1x1x14x14xf32>
    %186 = vector.shape_cast %185 : vector<1x1x14x14xf32> to vector<14x14xf32>
    %c11 = arith.constant 11 : index
    %187 = memref.load %arg2[%c11] : memref<36xf32, #tpu.memory_space<smem>>
    %188 = vector.broadcast %187 : f32 to vector<14x14xf32>
    %189 = arith.mulf %186, %188 : vector<14x14xf32>
    %190 = arith.addf %184, %189 : vector<14x14xf32>
    %c0_125 = arith.constant 0 : index
    %c3_126 = arith.constant 3 : index
    %c1_127 = arith.constant 1 : index
    %c0_128 = arith.constant 0 : index
    %191 = vector.load %arg1[%c0_125, %c3_126, %c1_127, %c0_128] : memref<1x4x16x16xf32, #tpu.memory_space<vmem>>, vector<1x1x14x14xf32>
    %192 = vector.shape_cast %191 : vector<1x1x14x14xf32> to vector<14x14xf32>
    %c15 = arith.constant 15 : index
    %193 = memref.load %arg2[%c15] : memref<36xf32, #tpu.memory_space<smem>>
    %194 = vector.broadcast %193 : f32 to vector<14x14xf32>
    %195 = arith.mulf %192, %194 : vector<14x14xf32>
    %196 = arith.addf %190, %195 : vector<14x14xf32>
    %c0_129 = arith.constant 0 : index
    %c3_130 = arith.constant 3 : index
    %c1_131 = arith.constant 1 : index
    %c1_132 = arith.constant 1 : index
    %197 = vector.load %arg1[%c0_129, %c3_130, %c1_131, %c1_132] : memref<1x4x16x16xf32, #tpu.memory_space<vmem>>, vector<1x1x14x14xf32>
    %198 = vector.shape_cast %197 : vector<1x1x14x14xf32> to vector<14x14xf32>
    %c19 = arith.constant 19 : index
    %199 = memref.load %arg2[%c19] : memref<36xf32, #tpu.memory_space<smem>>
    %200 = vector.broadcast %199 : f32 to vector<14x14xf32>
    %201 = arith.mulf %198, %200 : vector<14x14xf32>
    %202 = arith.addf %196, %201 : vector<14x14xf32>
    %c0_133 = arith.constant 0 : index
    %c3_134 = arith.constant 3 : index
    %c1_135 = arith.constant 1 : index
    %c2_136 = arith.constant 2 : index
    %203 = vector.load %arg1[%c0_133, %c3_134, %c1_135, %c2_136] : memref<1x4x16x16xf32, #tpu.memory_space<vmem>>, vector<1x1x14x14xf32>
    %204 = vector.shape_cast %203 : vector<1x1x14x14xf32> to vector<14x14xf32>
    %c23 = arith.constant 23 : index
    %205 = memref.load %arg2[%c23] : memref<36xf32, #tpu.memory_space<smem>>
    %206 = vector.broadcast %205 : f32 to vector<14x14xf32>
    %207 = arith.mulf %204, %206 : vector<14x14xf32>
    %208 = arith.addf %202, %207 : vector<14x14xf32>
    %c0_137 = arith.constant 0 : index
    %c3_138 = arith.constant 3 : index
    %c2_139 = arith.constant 2 : index
    %c0_140 = arith.constant 0 : index
    %209 = vector.load %arg1[%c0_137, %c3_138, %c2_139, %c0_140] : memref<1x4x16x16xf32, #tpu.memory_space<vmem>>, vector<1x1x14x14xf32>
    %210 = vector.shape_cast %209 : vector<1x1x14x14xf32> to vector<14x14xf32>
    %c27 = arith.constant 27 : index
    %211 = memref.load %arg2[%c27] : memref<36xf32, #tpu.memory_space<smem>>
    %212 = vector.broadcast %211 : f32 to vector<14x14xf32>
    %213 = arith.mulf %210, %212 : vector<14x14xf32>
    %214 = arith.addf %208, %213 : vector<14x14xf32>
    %c0_141 = arith.constant 0 : index
    %c3_142 = arith.constant 3 : index
    %c2_143 = arith.constant 2 : index
    %c1_144 = arith.constant 1 : index
    %215 = vector.load %arg1[%c0_141, %c3_142, %c2_143, %c1_144] : memref<1x4x16x16xf32, #tpu.memory_space<vmem>>, vector<1x1x14x14xf32>
    %216 = vector.shape_cast %215 : vector<1x1x14x14xf32> to vector<14x14xf32>
    %c31 = arith.constant 31 : index
    %217 = memref.load %arg2[%c31] : memref<36xf32, #tpu.memory_space<smem>>
    %218 = vector.broadcast %217 : f32 to vector<14x14xf32>
    %219 = arith.mulf %216, %218 : vector<14x14xf32>
    %220 = arith.addf %214, %219 : vector<14x14xf32>
    %c0_145 = arith.constant 0 : index
    %c3_146 = arith.constant 3 : index
    %c2_147 = arith.constant 2 : index
    %c2_148 = arith.constant 2 : index
    %221 = vector.load %arg1[%c0_145, %c3_146, %c2_147, %c2_148] : memref<1x4x16x16xf32, #tpu.memory_space<vmem>>, vector<1x1x14x14xf32>
    %222 = vector.shape_cast %221 : vector<1x1x14x14xf32> to vector<14x14xf32>
    %c35 = arith.constant 35 : index
    %223 = memref.load %arg2[%c35] : memref<36xf32, #tpu.memory_space<smem>>
    %224 = vector.broadcast %223 : f32 to vector<14x14xf32>
    %225 = arith.mulf %222, %224 : vector<14x14xf32>
    %226 = arith.addf %220, %225 : vector<14x14xf32>
    %c3_149 = arith.constant 3 : index
    %227 = memref.load %arg3[%c3_149] : memref<4xf32, #tpu.memory_space<smem>>
    %228 = vector.broadcast %227 : f32 to vector<14x14xf32>
    %229 = arith.addf %226, %228 : vector<14x14xf32>
    %cst_150 = arith.constant 0.000000e+00 : f32
    %230 = vector.broadcast %cst_150 : f32 to vector<14x14xf32>
    %231 = arith.maximumf %229, %230 : vector<14x14xf32>
    %c0_151 = arith.constant 0 : index
    %232 = memref.load %arg4[%c0_151] : memref<32xf32, #tpu.memory_space<smem>>
    %233 = vector.broadcast %232 : f32 to vector<14x14xf32>
    %234 = arith.mulf %57, %233 : vector<14x14xf32>
    %c8_152 = arith.constant 8 : index
    %235 = memref.load %arg4[%c8_152] : memref<32xf32, #tpu.memory_space<smem>>
    %236 = vector.broadcast %235 : f32 to vector<14x14xf32>
    %237 = arith.mulf %115, %236 : vector<14x14xf32>
    %238 = arith.addf %234, %237 : vector<14x14xf32>
    %c16_153 = arith.constant 16 : index
    %239 = memref.load %arg4[%c16_153] : memref<32xf32, #tpu.memory_space<smem>>
    %240 = vector.broadcast %239 : f32 to vector<14x14xf32>
    %241 = arith.mulf %173, %240 : vector<14x14xf32>
    %242 = arith.addf %238, %241 : vector<14x14xf32>
    %c24_154 = arith.constant 24 : index
    %243 = memref.load %arg4[%c24_154] : memref<32xf32, #tpu.memory_space<smem>>
    %244 = vector.broadcast %243 : f32 to vector<14x14xf32>
    %245 = arith.mulf %231, %244 : vector<14x14xf32>
    %246 = arith.addf %242, %245 : vector<14x14xf32>
    %c0_155 = arith.constant 0 : index
    %247 = memref.load %arg5[%c0_155] : memref<8xf32, #tpu.memory_space<smem>>
    %248 = vector.broadcast %247 : f32 to vector<14x14xf32>
    %249 = arith.addf %246, %248 : vector<14x14xf32>
    %cst_156 = arith.constant 0.000000e+00 : f32
    %250 = vector.broadcast %cst_156 : f32 to vector<14x14xf32>
    %251 = arith.maximumf %249, %250 : vector<14x14xf32>
    %c0_157 = arith.constant 0 : index
    %c0_158 = arith.constant 0 : index
    %c0_159 = arith.constant 0 : index
    %c0_160 = arith.constant 0 : index
    %252 = vector.load %arg6[%c0_157, %c0_158, %c0_159, %c0_160] : memref<1x8x14x14xf32, #tpu.memory_space<vmem>>, vector<1x1x14x14xf32>
    %253 = vector.shape_cast %252 : vector<1x1x14x14xf32> to vector<14x14xf32>
    %254 = vector.shape_cast %251 : vector<14x14xf32> to vector<1x1x14x14xf32>
    tpu.vector_store %arg6[%c0_157, %c0_158, %c0_159, %c0_160], %254 {strides = array<i32>} : memref<1x8x14x14xf32, #tpu.memory_space<vmem>>, vector<1x1x14x14xf32>,
    %c1_161 = arith.constant 1 : index
    %255 = memref.load %arg4[%c1_161] : memref<32xf32, #tpu.memory_space<smem>>
    %256 = vector.broadcast %255 : f32 to vector<14x14xf32>
    %257 = arith.mulf %57, %256 : vector<14x14xf32>
    %c9_162 = arith.constant 9 : index
    %258 = memref.load %arg4[%c9_162] : memref<32xf32, #tpu.memory_space<smem>>
    %259 = vector.broadcast %258 : f32 to vector<14x14xf32>
    %260 = arith.mulf %115, %259 : vector<14x14xf32>
    %261 = arith.addf %257, %260 : vector<14x14xf32>
    %c17_163 = arith.constant 17 : index
    %262 = memref.load %arg4[%c17_163] : memref<32xf32, #tpu.memory_space<smem>>
    %263 = vector.broadcast %262 : f32 to vector<14x14xf32>
    %264 = arith.mulf %173, %263 : vector<14x14xf32>
    %265 = arith.addf %261, %264 : vector<14x14xf32>
    %c25_164 = arith.constant 25 : index
    %266 = memref.load %arg4[%c25_164] : memref<32xf32, #tpu.memory_space<smem>>
    %267 = vector.broadcast %266 : f32 to vector<14x14xf32>
    %268 = arith.mulf %231, %267 : vector<14x14xf32>
    %269 = arith.addf %265, %268 : vector<14x14xf32>
    %c1_165 = arith.constant 1 : index
    %270 = memref.load %arg5[%c1_165] : memref<8xf32, #tpu.memory_space<smem>>
    %271 = vector.broadcast %270 : f32 to vector<14x14xf32>
    %272 = arith.addf %269, %271 : vector<14x14xf32>
    %cst_166 = arith.constant 0.000000e+00 : f32
    %273 = vector.broadcast %cst_166 : f32 to vector<14x14xf32>
    %274 = arith.maximumf %272, %273 : vector<14x14xf32>
    %c0_167 = arith.constant 0 : index
    %c1_168 = arith.constant 1 : index
    %c0_169 = arith.constant 0 : index
    %c0_170 = arith.constant 0 : index
    %275 = vector.load %arg6[%c0_167, %c1_168, %c0_169, %c0_170] : memref<1x8x14x14xf32, #tpu.memory_space<vmem>>, vector<1x1x14x14xf32>
    %276 = vector.shape_cast %275 : vector<1x1x14x14xf32> to vector<14x14xf32>
    %277 = vector.shape_cast %274 : vector<14x14xf32> to vector<1x1x14x14xf32>
    tpu.vector_store %arg6[%c0_167, %c1_168, %c0_169, %c0_170], %277 {strides = array<i32>} : memref<1x8x14x14xf32, #tpu.memory_space<vmem>>, vector<1x1x14x14xf32>,
    %c2_171 = arith.constant 2 : index
    %278 = memref.load %arg4[%c2_171] : memref<32xf32, #tpu.memory_space<smem>>
    %279 = vector.broadcast %278 : f32 to vector<14x14xf32>
    %280 = arith.mulf %57, %279 : vector<14x14xf32>
    %c10_172 = arith.constant 10 : index
    %281 = memref.load %arg4[%c10_172] : memref<32xf32, #tpu.memory_space<smem>>
    %282 = vector.broadcast %281 : f32 to vector<14x14xf32>
    %283 = arith.mulf %115, %282 : vector<14x14xf32>
    %284 = arith.addf %280, %283 : vector<14x14xf32>
    %c18_173 = arith.constant 18 : index
    %285 = memref.load %arg4[%c18_173] : memref<32xf32, #tpu.memory_space<smem>>
    %286 = vector.broadcast %285 : f32 to vector<14x14xf32>
    %287 = arith.mulf %173, %286 : vector<14x14xf32>
    %288 = arith.addf %284, %287 : vector<14x14xf32>
    %c26_174 = arith.constant 26 : index
    %289 = memref.load %arg4[%c26_174] : memref<32xf32, #tpu.memory_space<smem>>
    %290 = vector.broadcast %289 : f32 to vector<14x14xf32>
    %291 = arith.mulf %231, %290 : vector<14x14xf32>
    %292 = arith.addf %288, %291 : vector<14x14xf32>
    %c2_175 = arith.constant 2 : index
    %293 = memref.load %arg5[%c2_175] : memref<8xf32, #tpu.memory_space<smem>>
    %294 = vector.broadcast %293 : f32 to vector<14x14xf32>
    %295 = arith.addf %292, %294 : vector<14x14xf32>
    %cst_176 = arith.constant 0.000000e+00 : f32
    %296 = vector.broadcast %cst_176 : f32 to vector<14x14xf32>
    %297 = arith.maximumf %295, %296 : vector<14x14xf32>
    %c0_177 = arith.constant 0 : index
    %c2_178 = arith.constant 2 : index
    %c0_179 = arith.constant 0 : index
    %c0_180 = arith.constant 0 : index
    %298 = vector.load %arg6[%c0_177, %c2_178, %c0_179, %c0_180] : memref<1x8x14x14xf32, #tpu.memory_space<vmem>>, vector<1x1x14x14xf32>
    %299 = vector.shape_cast %298 : vector<1x1x14x14xf32> to vector<14x14xf32>
    %300 = vector.shape_cast %297 : vector<14x14xf32> to vector<1x1x14x14xf32>
    tpu.vector_store %arg6[%c0_177, %c2_178, %c0_179, %c0_180], %300 {strides = array<i32>} : memref<1x8x14x14xf32, #tpu.memory_space<vmem>>, vector<1x1x14x14xf32>,
    %c3_181 = arith.constant 3 : index
    %301 = memref.load %arg4[%c3_181] : memref<32xf32, #tpu.memory_space<smem>>
    %302 = vector.broadcast %301 : f32 to vector<14x14xf32>
    %303 = arith.mulf %57, %302 : vector<14x14xf32>
    %c11_182 = arith.constant 11 : index
    %304 = memref.load %arg4[%c11_182] : memref<32xf32, #tpu.memory_space<smem>>
    %305 = vector.broadcast %304 : f32 to vector<14x14xf32>
    %306 = arith.mulf %115, %305 : vector<14x14xf32>
    %307 = arith.addf %303, %306 : vector<14x14xf32>
    %c19_183 = arith.constant 19 : index
    %308 = memref.load %arg4[%c19_183] : memref<32xf32, #tpu.memory_space<smem>>
    %309 = vector.broadcast %308 : f32 to vector<14x14xf32>
    %310 = arith.mulf %173, %309 : vector<14x14xf32>
    %311 = arith.addf %307, %310 : vector<14x14xf32>
    %c27_184 = arith.constant 27 : index
    %312 = memref.load %arg4[%c27_184] : memref<32xf32, #tpu.memory_space<smem>>
    %313 = vector.broadcast %312 : f32 to vector<14x14xf32>
    %314 = arith.mulf %231, %313 : vector<14x14xf32>
    %315 = arith.addf %311, %314 : vector<14x14xf32>
    %c3_185 = arith.constant 3 : index
    %316 = memref.load %arg5[%c3_185] : memref<8xf32, #tpu.memory_space<smem>>
    %317 = vector.broadcast %316 : f32 to vector<14x14xf32>
    %318 = arith.addf %315, %317 : vector<14x14xf32>
    %cst_186 = arith.constant 0.000000e+00 : f32
    %319 = vector.broadcast %cst_186 : f32 to vector<14x14xf32>
    %320 = arith.maximumf %318, %319 : vector<14x14xf32>
    %c0_187 = arith.constant 0 : index
    %c3_188 = arith.constant 3 : index
    %c0_189 = arith.constant 0 : index
    %c0_190 = arith.constant 0 : index
    %321 = vector.load %arg6[%c0_187, %c3_188, %c0_189, %c0_190] : memref<1x8x14x14xf32, #tpu.memory_space<vmem>>, vector<1x1x14x14xf32>
    %322 = vector.shape_cast %321 : vector<1x1x14x14xf32> to vector<14x14xf32>
    %323 = vector.shape_cast %320 : vector<14x14xf32> to vector<1x1x14x14xf32>
    tpu.vector_store %arg6[%c0_187, %c3_188, %c0_189, %c0_190], %323 {strides = array<i32>} : memref<1x8x14x14xf32, #tpu.memory_space<vmem>>, vector<1x1x14x14xf32>,
    %c4_191 = arith.constant 4 : index
    %324 = memref.load %arg4[%c4_191] : memref<32xf32, #tpu.memory_space<smem>>
    %325 = vector.broadcast %324 : f32 to vector<14x14xf32>
    %326 = arith.mulf %57, %325 : vector<14x14xf32>
    %c12_192 = arith.constant 12 : index
    %327 = memref.load %arg4[%c12_192] : memref<32xf32, #tpu.memory_space<smem>>
    %328 = vector.broadcast %327 : f32 to vector<14x14xf32>
    %329 = arith.mulf %115, %328 : vector<14x14xf32>
    %330 = arith.addf %326, %329 : vector<14x14xf32>
    %c20_193 = arith.constant 20 : index
    %331 = memref.load %arg4[%c20_193] : memref<32xf32, #tpu.memory_space<smem>>
    %332 = vector.broadcast %331 : f32 to vector<14x14xf32>
    %333 = arith.mulf %173, %332 : vector<14x14xf32>
    %334 = arith.addf %330, %333 : vector<14x14xf32>
    %c28_194 = arith.constant 28 : index
    %335 = memref.load %arg4[%c28_194] : memref<32xf32, #tpu.memory_space<smem>>
    %336 = vector.broadcast %335 : f32 to vector<14x14xf32>
    %337 = arith.mulf %231, %336 : vector<14x14xf32>
    %338 = arith.addf %334, %337 : vector<14x14xf32>
    %c4_195 = arith.constant 4 : index
    %339 = memref.load %arg5[%c4_195] : memref<8xf32, #tpu.memory_space<smem>>
    %340 = vector.broadcast %339 : f32 to vector<14x14xf32>
    %341 = arith.addf %338, %340 : vector<14x14xf32>
    %cst_196 = arith.constant 0.000000e+00 : f32
    %342 = vector.broadcast %cst_196 : f32 to vector<14x14xf32>
    %343 = arith.maximumf %341, %342 : vector<14x14xf32>
    %c0_197 = arith.constant 0 : index
    %c4_198 = arith.constant 4 : index
    %c0_199 = arith.constant 0 : index
    %c0_200 = arith.constant 0 : index
    %344 = vector.load %arg6[%c0_197, %c4_198, %c0_199, %c0_200] : memref<1x8x14x14xf32, #tpu.memory_space<vmem>>, vector<1x1x14x14xf32>
    %345 = vector.shape_cast %344 : vector<1x1x14x14xf32> to vector<14x14xf32>
    %346 = vector.shape_cast %343 : vector<14x14xf32> to vector<1x1x14x14xf32>
    tpu.vector_store %arg6[%c0_197, %c4_198, %c0_199, %c0_200], %346 {strides = array<i32>} : memref<1x8x14x14xf32, #tpu.memory_space<vmem>>, vector<1x1x14x14xf32>,
    %c5_201 = arith.constant 5 : index
    %347 = memref.load %arg4[%c5_201] : memref<32xf32, #tpu.memory_space<smem>>
    %348 = vector.broadcast %347 : f32 to vector<14x14xf32>
    %349 = arith.mulf %57, %348 : vector<14x14xf32>
    %c13_202 = arith.constant 13 : index
    %350 = memref.load %arg4[%c13_202] : memref<32xf32, #tpu.memory_space<smem>>
    %351 = vector.broadcast %350 : f32 to vector<14x14xf32>
    %352 = arith.mulf %115, %351 : vector<14x14xf32>
    %353 = arith.addf %349, %352 : vector<14x14xf32>
    %c21_203 = arith.constant 21 : index
    %354 = memref.load %arg4[%c21_203] : memref<32xf32, #tpu.memory_space<smem>>
    %355 = vector.broadcast %354 : f32 to vector<14x14xf32>
    %356 = arith.mulf %173, %355 : vector<14x14xf32>
    %357 = arith.addf %353, %356 : vector<14x14xf32>
    %c29_204 = arith.constant 29 : index
    %358 = memref.load %arg4[%c29_204] : memref<32xf32, #tpu.memory_space<smem>>
    %359 = vector.broadcast %358 : f32 to vector<14x14xf32>
    %360 = arith.mulf %231, %359 : vector<14x14xf32>
    %361 = arith.addf %357, %360 : vector<14x14xf32>
    %c5_205 = arith.constant 5 : index
    %362 = memref.load %arg5[%c5_205] : memref<8xf32, #tpu.memory_space<smem>>
    %363 = vector.broadcast %362 : f32 to vector<14x14xf32>
    %364 = arith.addf %361, %363 : vector<14x14xf32>
    %cst_206 = arith.constant 0.000000e+00 : f32
    %365 = vector.broadcast %cst_206 : f32 to vector<14x14xf32>
    %366 = arith.maximumf %364, %365 : vector<14x14xf32>
    %c0_207 = arith.constant 0 : index
    %c5_208 = arith.constant 5 : index
    %c0_209 = arith.constant 0 : index
    %c0_210 = arith.constant 0 : index
    %367 = vector.load %arg6[%c0_207, %c5_208, %c0_209, %c0_210] : memref<1x8x14x14xf32, #tpu.memory_space<vmem>>, vector<1x1x14x14xf32>
    %368 = vector.shape_cast %367 : vector<1x1x14x14xf32> to vector<14x14xf32>
    %369 = vector.shape_cast %366 : vector<14x14xf32> to vector<1x1x14x14xf32>
    tpu.vector_store %arg6[%c0_207, %c5_208, %c0_209, %c0_210], %369 {strides = array<i32>} : memref<1x8x14x14xf32, #tpu.memory_space<vmem>>, vector<1x1x14x14xf32>,
    %c6_211 = arith.constant 6 : index
    %370 = memref.load %arg4[%c6_211] : memref<32xf32, #tpu.memory_space<smem>>
    %371 = vector.broadcast %370 : f32 to vector<14x14xf32>
    %372 = arith.mulf %57, %371 : vector<14x14xf32>
    %c14_212 = arith.constant 14 : index
    %373 = memref.load %arg4[%c14_212] : memref<32xf32, #tpu.memory_space<smem>>
    %374 = vector.broadcast %373 : f32 to vector<14x14xf32>
    %375 = arith.mulf %115, %374 : vector<14x14xf32>
    %376 = arith.addf %372, %375 : vector<14x14xf32>
    %c22_213 = arith.constant 22 : index
    %377 = memref.load %arg4[%c22_213] : memref<32xf32, #tpu.memory_space<smem>>
    %378 = vector.broadcast %377 : f32 to vector<14x14xf32>
    %379 = arith.mulf %173, %378 : vector<14x14xf32>
    %380 = arith.addf %376, %379 : vector<14x14xf32>
    %c30_214 = arith.constant 30 : index
    %381 = memref.load %arg4[%c30_214] : memref<32xf32, #tpu.memory_space<smem>>
    %382 = vector.broadcast %381 : f32 to vector<14x14xf32>
    %383 = arith.mulf %231, %382 : vector<14x14xf32>
    %384 = arith.addf %380, %383 : vector<14x14xf32>
    %c6_215 = arith.constant 6 : index
    %385 = memref.load %arg5[%c6_215] : memref<8xf32, #tpu.memory_space<smem>>
    %386 = vector.broadcast %385 : f32 to vector<14x14xf32>
    %387 = arith.addf %384, %386 : vector<14x14xf32>
    %cst_216 = arith.constant 0.000000e+00 : f32
    %388 = vector.broadcast %cst_216 : f32 to vector<14x14xf32>
    %389 = arith.maximumf %387, %388 : vector<14x14xf32>
    %c0_217 = arith.constant 0 : index
    %c6_218 = arith.constant 6 : index
    %c0_219 = arith.constant 0 : index
    %c0_220 = arith.constant 0 : index
    %390 = vector.load %arg6[%c0_217, %c6_218, %c0_219, %c0_220] : memref<1x8x14x14xf32, #tpu.memory_space<vmem>>, vector<1x1x14x14xf32>
    %391 = vector.shape_cast %390 : vector<1x1x14x14xf32> to vector<14x14xf32>
    %392 = vector.shape_cast %389 : vector<14x14xf32> to vector<1x1x14x14xf32>
    tpu.vector_store %arg6[%c0_217, %c6_218, %c0_219, %c0_220], %392 {strides = array<i32>} : memref<1x8x14x14xf32, #tpu.memory_space<vmem>>, vector<1x1x14x14xf32>,
    %c7_221 = arith.constant 7 : index
    %393 = memref.load %arg4[%c7_221] : memref<32xf32, #tpu.memory_space<smem>>
    %394 = vector.broadcast %393 : f32 to vector<14x14xf32>
    %395 = arith.mulf %57, %394 : vector<14x14xf32>
    %c15_222 = arith.constant 15 : index
    %396 = memref.load %arg4[%c15_222] : memref<32xf32, #tpu.memory_space<smem>>
    %397 = vector.broadcast %396 : f32 to vector<14x14xf32>
    %398 = arith.mulf %115, %397 : vector<14x14xf32>
    %399 = arith.addf %395, %398 : vector<14x14xf32>
    %c23_223 = arith.constant 23 : index
    %400 = memref.load %arg4[%c23_223] : memref<32xf32, #tpu.memory_space<smem>>
    %401 = vector.broadcast %400 : f32 to vector<14x14xf32>
    %402 = arith.mulf %173, %401 : vector<14x14xf32>
    %403 = arith.addf %399, %402 : vector<14x14xf32>
    %c31_224 = arith.constant 31 : index
    %404 = memref.load %arg4[%c31_224] : memref<32xf32, #tpu.memory_space<smem>>
    %405 = vector.broadcast %404 : f32 to vector<14x14xf32>
    %406 = arith.mulf %231, %405 : vector<14x14xf32>
    %407 = arith.addf %403, %406 : vector<14x14xf32>
    %c7_225 = arith.constant 7 : index
    %408 = memref.load %arg5[%c7_225] : memref<8xf32, #tpu.memory_space<smem>>
    %409 = vector.broadcast %408 : f32 to vector<14x14xf32>
    %410 = arith.addf %407, %409 : vector<14x14xf32>
    %cst_226 = arith.constant 0.000000e+00 : f32
    %411 = vector.broadcast %cst_226 : f32 to vector<14x14xf32>
    %412 = arith.maximumf %410, %411 : vector<14x14xf32>
    %c0_227 = arith.constant 0 : index
    %c7_228 = arith.constant 7 : index
    %c0_229 = arith.constant 0 : index
    %c0_230 = arith.constant 0 : index
    %413 = vector.load %arg6[%c0_227, %c7_228, %c0_229, %c0_230] : memref<1x8x14x14xf32, #tpu.memory_space<vmem>>, vector<1x1x14x14xf32>
    %414 = vector.shape_cast %413 : vector<1x1x14x14xf32> to vector<14x14xf32>
    %415 = vector.shape_cast %412 : vector<14x14xf32> to vector<1x1x14x14xf32>
    tpu.vector_store %arg6[%c0_227, %c7_228, %c0_229, %c0_230], %415 {strides = array<i32>} : memref<1x8x14x14xf32, #tpu.memory_space<vmem>>, vector<1x1x14x14xf32>,
    return
  }
  func.func @transform_0(%arg0: i32) -> (i32, i32, i32, i32) {
    %c0_i32 = arith.constant 0 : i32
    %c0_i32_0 = arith.constant 0 : i32
    %c0_i32_1 = arith.constant 0 : i32
    %c0_i32_2 = arith.constant 0 : i32
    return %arg0, %c0_i32, %c0_i32_0, %c0_i32_1 : i32, i32, i32, i32
  }
  func.func @transform_1(%arg0: i32) -> i32 {
    %c0_i32 = arith.constant 0 : i32
    %c0_i32_0 = arith.constant 0 : i32
    return %c0_i32 : i32
  }
  func.func @transform_2(%arg0: i32) -> i32 {
    %c0_i32 = arith.constant 0 : i32
    %c0_i32_0 = arith.constant 0 : i32
    return %c0_i32 : i32
  }
  func.func @transform_3(%arg0: i32) -> i32 {
    %c0_i32 = arith.constant 0 : i32
    %c0_i32_0 = arith.constant 0 : i32
    return %c0_i32 : i32
  }
  func.func @transform_4(%arg0: i32) -> i32 {
    %c0_i32 = arith.constant 0 : i32
    %c0_i32_0 = arith.constant 0 : i32
    return %c0_i32 : i32
  }
  func.func @transform_5(%arg0: i32) -> (i32, i32, i32, i32) {
    %c0_i32 = arith.constant 0 : i32
    %c0_i32_0 = arith.constant 0 : i32
    %c0_i32_1 = arith.constant 0 : i32
    %c0_i32_2 = arith.constant 0 : i32
    return %arg0, %c0_i32, %c0_i32_0, %c0_i32_1 : i32, i32, i32, i32
  }
}

</mosaic_0001>

<bundles_post_ra>
// kernel: tpu_custom_call.1
= control target key start
LH: loop header
LB: loop body
LE: loop exit
PB: predicated region body
PF: predicated region fallthrough
CT: control target
= control target key end

     0   :  { %s2178_s0 = inlined_call_operand.hbm [shape: f32[2,4,16,16], index: 0, kind: input, shape index: {}]   ;;  %s2179_s1 = inlined_call_operand.vmem [shape: f32[36], index: 1, kind: input, shape index: {}]   ;;  %s2180_s2 = inlined_call_operand.vmem [shape: f32[4], index: 2, kind: input, shape index: {}]   ;;  %s2181_s3 = inlined_call_operand.vmem [shape: f32[32], index: 3, kind: input, shape index: {}]   ;;  %s2182_s4 = inlined_call_operand.vmem [shape: f32[8], index: 4, kind: input, shape index: {}]   ;;  %s2183_s5 = inlined_call_operand.vmem [shape: f32[2,8,14,14], index: 5, kind: output, shape index: {}]  }
   0x1   :  { %2187 = sst [smem:[#allocation15_spill]] %s2178_s0 }
   0x2   :  { %2188 = sst [smem:[#allocation16_spill]] %s2179_s1 }
   0x3   :  { %2189 = sst [smem:[#allocation17_spill]] %s2180_s2 }
   0x4   :  { %2190 = sst [smem:[#allocation18_spill]] %s2181_s3 }
   0x5   :  { %10 = vsyncpa [#allocation3], 0 }
   0x6   :  { %12 = vsyncpa [#allocation3 + $0x1], 0 }
   0x7   :  { %13 = vsyncpa [#allocation4], 0 }
   0x8   :  { %14 = vsyncpa [#allocation7], 0 }
   0x9   :  { %15 = vsyncpa [#allocation10], 0  ;;  %s1494_s18 = smov 0   ;;  %s1496_s19 = smov 0  }
   0xa   :  { %s1498_s20 = smov 0   ;;  %s1500_s21 = smov 0  }
   0xb LB: > { %s1513_s22 = sadd.s32 4294967295, %s1453_s21   ;;  %p41_p0 = scmp.ne.s32.totalorder %s1445_s19, %s1441_s18  ;;  %s1453_s21 = sphi %s1500_s21, %s2210_s21   ;;  %s1449_s20 = sphi %s1498_s20, %s2209_s20   ;;  %s1445_s19 = sphi %s1496_s19, %s2208_s19   ;;  %s1441_s18 = sphi %s1494_s18, %s2207_s18  }
   0xc   : > { %p2184_p1 = scmp.eq.s32.totalorder %s1513_s22, 0  ;;  %p1106_p2 = scmp.ge.s32.totalorder %s1453_s21, 1 }
   0xd   : > { %p162_p3 = scmp.lt.s32.totalorder %s1453_s21, 3  ;;  %s2192_s2 = sld [smem:[#allocation17_spill]] }
   0xe   : > { %p1521_p4 = por %p2184_p1, %p41_p0  ;;  %s2194_s1 = sld [smem:[#allocation16_spill]] }
   0xf   : > { %p1528_p5 = pnand %p1106_p2, %p162_p3  ;;  %s2196_s3 = sld [smem:[#allocation18_spill]] }
  0x10   : > { %s2191_s23 = scalar_select %p1521_p4, 1, 0 }
  0x11   : > { %s2193_s27 = scalar_select %p1528_p5, 1, 0 }
  0x12   : > { %p1253_p6 = pneg %p1528_p5  ;;  %s208_s12 = sshll.u32 %s2182_s4, 4  ;;  %s209_s12 = int_to_ptr.vmem [resolvable:$true] %s208_s12 }
  0x13   : > { %s186_s26 = sshll.u32 %s2192_s2, 4  ;;  %s187_s26 = int_to_ptr.vmem [resolvable:$true] %s186_s26 }
  0x14   : > { %s175_s30 = sshll.u32 %s2194_s1, 4  ;;  %p1539_p7 = pnand %p1253_p6, %p2184_p1  ;;  %s176_s30 = int_to_ptr.vmem [resolvable:$true] %s175_s30 }
  0x15   : > { %s197_s9 = sshll.u32 %s2196_s3, 4  ;;  %s1319_s13 = scalar_lea.vmem %s187_s26, 16  ;;  %s1546_s9 = int_to_ptr.vmem [resolvable:$true] %s197_s9 }
  0x16   : > { %p1320_p8 = scmp.ne.s32.totalorder %s187_s26, %s1319_s13  ;;  %p1321_p9 = pneg %p1539_p7 }
  0x17   : > { %p1327_p12 = scmp.lt.s32.totalorder %s187_s26, %s187_s26  ;;  %p1328_p13 = scmp.lt.s32.totalorder %s1319_s13, %s1319_s13 }
  0x18   : > { %p1322_p10 = pnand %p1321_p9, %p1320_p8 }
  0x19   : > { %p1329_p0 = por %p1328_p13, %p1327_p12 }
  0x1a   : > { %p1323_p11 = pneg %p1322_p10 }
  0x1c   : > { %p1330_p2 = pnand %p1329_p0, %p1323_p11 }
  0x1e   : > { %1333 = shalt.err (!%p1330_p2)
}
  0x1f   : > { %s1455_s14 = smov [#allocation6]   ;;  %s1334_s15 = scalar_lea.vmem %s176_s30, 16 }
  0x20   : > { %1259 = dma.vmem_to_smem (!%p1539_p7), %s187_s26, 16, %s1455_s14, [#allocation7]  }
  0x21   : > { %p1335_p3 = scmp.ne.s32.totalorder %s176_s30, %s1334_s15  ;;  %p1342_p4 = scmp.lt.s32.totalorder %s176_s30, %s176_s30 }
  0x22   : > { %p1343_p5 = scmp.lt.s32.totalorder %s1334_s15, %s1334_s15 }
  0x23   : > { %p1337_p6 = pnand %p1335_p3, %p1321_p9 }
  0x24   : > { %p1344_p8 = por %p1343_p5, %p1342_p4 }
  0x25   : > { %p1338_p1 = pneg %p1337_p6 }
  0x27   : > { %p1345_p10 = pnand %p1344_p8, %p1338_p1 }
  0x29   : > { %1348 = shalt.err (!%p1345_p10)
}
  0x2a   : > { %s1456_s16 = smov [#allocation5]   ;;  %s1349_s17 = scalar_lea.vmem %s1546_s9, 16 }
  0x2b   : > { %1256 = dma.vmem_to_smem (!%p1539_p7), %s176_s30, 16, %s1456_s16, [#allocation4]  }
  0x2c   : > { %p1350_p11 = scmp.ne.s32.totalorder %s1546_s9, %s1349_s17  ;;  %p1357_p0 = scmp.lt.s32.totalorder %s1546_s9, %s1546_s9 }
  0x2d   : > { %p1358_p2 = scmp.lt.s32.totalorder %s1349_s17, %s1349_s17 }
  0x2e   : > { %p1352_p12 = pnand %p1350_p11, %p1321_p9 }
  0x2f   : > { %p1359_p4 = por %p1358_p2, %p1357_p0 }
  0x30   : > { %p1353_p13 = pneg %p1352_p12 }
  0x32   : > { %p1360_p1 = pnand %p1359_p4, %p1353_p13 }
  0x34   : > { %1363 = shalt.err (!%p1360_p1)
}
  0x35   : > { %s1457_s18 = smov [#allocation8]   ;;  %s1364_s26 = scalar_lea.vmem %s209_s12, 16 }
  0x36   : > { %1262 = dma.vmem_to_smem (!%p1539_p7), %s1546_s9, 16, %s1457_s18, [#allocation7]  }
  0x37   : > { %p1365_p5 = scmp.ne.s32.totalorder %s209_s12, %s1364_s26  ;;  %p1372_p8 = scmp.lt.s32.totalorder %s209_s12, %s209_s12 }
  0x38   : > { %p1373_p10 = scmp.lt.s32.totalorder %s1364_s26, %s1364_s26 }
  0x39   : > { %p1367_p3 = pnand %p1365_p5, %p1321_p9 }
  0x3a   : > { %p1374_p11 = por %p1373_p10, %p1372_p8 }
  0x3b   : > { %p1368_p6 = pneg %p1367_p3 }
  0x3d   : > { %p1375_p12 = pnand %p1374_p11, %p1368_p6 }
  0x3f   : > { %1378 = shalt.err (!%p1375_p12)
}
  0x40   : > { %s1458_s28 = smov [#allocation9]   ;;  %s1583_s29 = sadd.s32 1, %s1453_s21  }
  0x41   : > { %1265 = dma.vmem_to_smem (!%p1539_p7), %s209_s12, 16, %s1458_s28, [#allocation10]  }
  0x42   : > { %s25_s30 = ssub.s32 %s1453_s21, %s1583_s29  ;;  %s28_s7 = sadd.s32 1, %s1449_s20 }
  0x43   : > { %p26_p9 = scmp.eq.s32.totalorder %s25_s30, 0  ;;  %p35_p13 = scmp.ne.s32.totalorder %s1449_s20, %s1445_s19 }
  0x44   : > { %p36_p0 = scmp.eq.s32.totalorder %s1453_s21, 0  ;;  %p1274_p4 = scmp.lt.s32.totalorder %s1453_s21, 2 }
  0x45   : > { %s1592_s6 = scalar_select %p26_p9, %s1449_s20, %s28_s7  }
  0x46   : > { %p37_p2 = por %p36_p0, %p35_p13  ;;  %s219_s8 = sand.u32 1, %s1449_s20  }
  0x47   : > { %s1233_s9 = sshll.u32 %s1453_s21, 10  ;;  %s1112_s10 = sshll.u32 %s219_s8, 6 }
  0x48   : > { %s2197_s0 = sld [smem:[#allocation15_spill]]  ;;  %s223_s12 = scalar_lea.vmem [#allocation2], %s1112_s10 }
  0x49   : > { %s230_s15 = sshll.u32 %s223_s12, 4  ;;  %p1602_p7 = pnand %p1274_p4, %p37_p2  ;;  %s1606_s15 = int_to_ptr.vmem [resolvable:$true] %s230_s15 }
  0x4a   : > { %s1608_s17 = scalar_lea.sflag [#allocation3], %s219_s8 }
  0x4b   : > { %p1381_p5 = pneg %p1602_p7 }
  0x4e   : > { %s1600_s14 = scalar_lea.hbm %s2197_s0, %s1233_s9  ;;  %s1384_s25 = scalar_lea.hbm %s2197_s0, 2048 }
  0x4f   : > { %s1379_s21 = scalar_lea.hbm %s1600_s14, 1024  ;;  %p1385_p8 = scmp.lt.s32.totalorder %s1600_s14, %s2197_s0 }
  0x50   : > { %p1380_p1 = scmp.ne.s32.totalorder %s1600_s14, %s1379_s21  ;;  %p1386_p10 = scmp.lt.s32.totalorder %s1384_s25, %s1379_s21 }
  0x52   : > { %p1382_p3 = pnand %p1381_p5, %p1380_p1  ;;  %p1387_p11 = por %p1386_p10, %p1385_p8 }
  0x54   : > { %p1383_p6 = pneg %p1382_p3 }
  0x56   : > { %p1388_p12 = pnand %p1387_p11, %p1383_p6 }
  0x58   : > { %1391 = shalt.err (!%p1388_p12)
}
  0x59   : > { %s1392_s30 = scalar_lea.vmem %s1606_s15, 1024  ;;  %s1459_s7 = smov [#allocation2]  }
  0x5a   : > { %p1393_p9 = scmp.ne.s32.totalorder %s1606_s15, %s1392_s30  ;;  %s1397_s8 = sshll.u32 %s1459_s7, 4  ;;  %s1398_s8 = int_to_ptr.vmem [resolvable:$false] %s1397_s8 }
  0x5b   : > { %s1399_s9 = scalar_lea.vmem %s1398_s8, 2048  ;;  %p1400_p2 = scmp.lt.s32.totalorder %s1606_s15, %s1398_s8 }
  0x5c   : > { %p1395_p13 = pnand %p1393_p9, %p1381_p5  ;;  %p1401_p4 = scmp.lt.s32.totalorder %s1399_s9, %s1392_s30 }
  0x5e   : > { %p1396_p0 = pneg %p1395_p13  ;;  %p1402_p1 = por %p1401_p4, %p1400_p2 }
  0x60   : > { %p1403_p3 = pnand %p1402_p1, %p1396_p0 }
  0x62   : > { %1406 = shalt.err (!%p1403_p3)
}
  0x63   : > { %s1460_s10 = smov 128   ;;  %s1461_s11 = smov 8  }
  0x64   : > { %1269 = dma.hbm_to_vmem [thread:$0]  (!%p1602_p7), %s1600_s14, 1024, %s1606_s15, %s1608_s17, %s1460_s10, %s1460_s10, %s1461_s11  }
  0x65   : > { %p2199_p5 = scmp.ne.s32.totalorder %s2193_s27, 0 }
  0x66   : > { %s244_s13 = sand.u32 (!%p2199_p5), 1, %s1445_s19   ;;  %p2200_p6 = scmp.ne.s32.totalorder (!%p2199_p5), %s2191_s23, 0 }
  0x67   : > { %242 = sbr.rel (%p2199_p5) target bundleno = 375 (0x177), region = 40  ;;  %s1116_s12 = sshll.u32 (!%p2199_p5), %s244_s13, 6 }
  0x68   : > { %s245_s21 = scalar_lea.sflag (!%p2199_p5), [#allocation3], %s244_s13  ;;  %s1632_s18 = scalar_lea.vmem (!%p2199_p5), [#allocation2], %s1116_s12 }
  0x6c   : > { %1424 = dma.done.wait (%p2200_p6), %s245_s21, 1024  }
  0x6d   : > { %1426 = vsyncadd (%p2200_p6), %s245_s21, 4294966272  ;;  %p2201_p8 = scmp.eq.s32.totalorder %s1513_s22, 0 }
  0x6f   : > { %1428 = dma.done.wait (%p2201_p8), [#allocation4], 16   ;;  %p2202_p7 = pmov %p2201_p8 }
  0x71   : > { %1430 = vsyncadd (%p2202_p7), [#allocation4], 4294967280  ;;  %p2203_p10 = pmov %p2202_p7 }
  0x72   : > { %p2204_p11 = pmov %p2202_p7 }
  0x73   : > { %1432 = dma.done.wait (%p2203_p10), [#allocation7], 32  }
  0x74   : > { %1434 = vsyncadd (%p2204_p11), [#allocation7], 4294967264  ;;  %p2205_p12 = pmov %p2202_p7 }
  0x75   : > { %p2206_p9 = pmov %p2202_p7 }
  0x76   : > { %1436 = dma.done.wait (%p2205_p12), [#allocation10], 16  }
  0x77   : > { %1438 = vsyncadd (%p2206_p9), [#allocation10], 4294967280 }
  0x78   : > { %269 = sfence }
  0x79   : > { %s1124_s23 = sld [smem:[#allocation5 + $0x8]]  ;;  %v1651_v0 = vld [vmem:[%s1632_s18] sm:$0xff]  ;;  %v1654_v2 = vld [vmem:[%s1632_s18 + $0x10] sm:$0xff]  ;;  %v1657_v3 = vld [vmem:[%s1632_s18 + $0x8] sm:$0x3f]  ;;  %s1462_s16 = smov 126  }
  0x7a   : > { %s1123_s27 = sld [smem:[#allocation5 + $0x4]]  ;;  %s1463_s17 = smov 127   ;;  %v1666_v10 = vld [vmem:[%s1632_s18 + $0x18] sm:$0x3f]  ;;  %v1677_v16 = vld [vmem:[%s1632_s18 + $0x28] sm:$0x3f] }
  0x7b   : > { %s1134_s14 = sld [smem:[#allocation5 + $0x5]]  ;;  %v1680_v18 = vld [vmem:[%s1632_s18 + $0x20] sm:$0xff]  ;;  %v1691_v24 = vld [vmem:[%s1632_s18 + $0x38] sm:$0x3f]  ;;  %v1694_v26 = vld [vmem:[%s1632_s18 + $0x30] sm:$0xff]  ;;  %p292_p13 = scmp.lt.s32.totalorder %s1513_s22, 1 }
  0x7c   : > { %s1135_s15 = sld [smem:[#allocation5 + $0x9]]  ;;  %v1701_v29 = vld [vmem:[%s1632_s18 + $0x9] sm:$0x3f]  ;;  %v1704_v31 = vld [vmem:[%s1632_s18 + $0x1] sm:$0xff]  ;;  %v1711_v34 = vld [vmem:[%s1632_s18 + $0x19] sm:$0x3f] }
  0x7d   : > { %s1150_s24 = sld [smem:[#allocation5 + $0x6]]  ;;  %v1714_v36 = vld [vmem:[%s1632_s18 + $0x11] sm:$0xff]  ;;  %v1733_v48 = vld [vmem:[%s1632_s18 + $0x29] sm:$0x3f]  ;;  %v1736_v50 = vld [vmem:[%s1632_s18 + $0x21] sm:$0xff]  ;;  %vm778_vm0 = vcmask 111616  }
  0x7e   : > { %s1151_s25 = sld [smem:[#allocation5 + $0xa]]  ;;  %v1747_v56 = vld [vmem:[%s1632_s18 + $0x39] sm:$0x3f]  ;;  %v1750_v58 = vld [vmem:[%s1632_s18 + $0x31] sm:$0xff]  ;;  %v1757_v61 = vld [vmem:[%s1632_s18 + $0xa] sm:$0x3f] }
  0x7f   : > { %v318_v1 = vstv %s1124_s23  ;;  %s1166_s26 = sld [smem:[#allocation5 + $0x7]]  ;;  %v1760_v63 = vld [vmem:[%s1632_s18 + $0x2] sm:$0xff]  ;;  %s2212_s22 = smov (!%p292_p13, %s1513_s22), 1  ;;  %vm776_vm1 = vcmask 113664  }
  0x80   : > { %v319_v4 = vmul.f32 %v318_v1, %v1651_v0  ;;  %v304_v5 = vstv %s1123_s27  ;;  %v320_v11 = vmul.f32 %v318_v1, %v1657_v3  ;;  %s1126_s28 = sld [smem:[#allocation5 + $0x10]] }
  0x81   : > { %v305_v6 = vmul.f32 %v304_v5, %v1651_v0  ;;  %v417_v7 = vstv %s1134_s14  ;;  %v306_v9 = vmul.f32 %v304_v5, %v1657_v3  ;;  %s1139_s30 = sld [smem:[#allocation5 + $0x11]]  ;;  %v1767_v5 = vld [vmem:[%s1632_s18 + $0x1a] sm:$0x3f] }
  0x82   : > { %323 = vrot.lane.b32.xlu1 %v319_v4, %s1462_s16  ;;  %v418_v8 = vmul.f32 %v1654_v2, %v417_v7  ;;  %v419_v12 = vmul.f32 %v1666_v10, %v417_v7  ;;  %v431_v13 = vstv %s1135_s15  ;;  %s1167_s7 = sld [smem:[#allocation5 + $0xb]]  ;;  %v1770_v7 = vld [vmem:[%s1632_s18 + $0x12] sm:$0xff] }
  0x83   : > { %309 = vrot.lane.b32.xlu0 %v305_v6, %s1463_s17  ;;  %v433_v14 = vmul.f32 %v1666_v10, %v431_v13  ;;  %v432_v15 = vmul.f32 %v1654_v2, %v431_v13  ;;  %v530_v17 = vstv %s1150_s24  ;;  %s1127_s8 = sld [smem:[#allocation5 + $0x14]] }
  0x84   : > { %v532_v19 = vmul.f32 %v1677_v16, %v530_v17  ;;  %v531_v20 = vmul.f32 %v1680_v18, %v530_v17  ;;  %v544_v21 = vstv %s1151_s25  ;;  %s1140_s9 = sld [smem:[#allocation5 + $0x15]] }
  0x85   : > { %v546_v22 = vmul.f32 %v1677_v16, %v544_v21  ;;  %v545_v23 = vmul.f32 %v1680_v18, %v544_v21  ;;  %v643_v25 = vstv %s1166_s26  ;;  %s1155_s10 = sld [smem:[#allocation5 + $0x12]] }
  0x86   : > { %422 = vrot.lane.b32.xlu1 %v418_v8, %s1463_s17  ;;  %v645_v27 = vmul.f32 %v1691_v24, %v643_v25  ;;  %v644_v28 = vmul.f32 %v1694_v26, %v643_v25  ;;  %v340_v30 = vstv %s1126_s28  ;;  %s1156_s11 = sld [smem:[#allocation5 + $0x16]]  ;;  %v1792_v25 = vld [vmem:[%s1632_s18 + $0x22] sm:$0xff] }
  0x87   : > { %311 = vrot.lane.b32.xlu0 %v306_v9, %s1463_s17  ;;  %v342_v32 = vmul.f32 %v340_v30, %v1701_v29  ;;  %v341_v33 = vmul.f32 %v340_v30, %v1704_v31  ;;  %v453_v35 = vstv %s1139_s30  ;;  %s1171_s13 = sld [smem:[#allocation5 + $0x13]] }
  0x88   : > { %v455_v37 = vmul.f32 %v1711_v34, %v453_v35  ;;  %v454_v38 = vmul.f32 %v1714_v36, %v453_v35  ;;  %v657_v39 = vstv %s1167_s7  ;;  %s1129_s12 = sld [smem:[#allocation5 + $0x1c]]  ;;  %v1803_v35 = vld [vmem:[%s1632_s18 + $0x3a] sm:$0x3f] }
  0x89   : > { %v659_v40 = vmul.f32 %v1691_v24, %v657_v39  ;;  %v658_v41 = vmul.f32 %v1694_v26, %v657_v39  ;;  %v354_v42 = vstv %s1127_s8  ;;  %s1144_s21 = sld [smem:[#allocation5 + $0x1d]] }
  0x8a   : > { %325 = vrot.lane.b32.xlu1 %v320_v11, %s1462_s16  ;;  %v356_v43 = vmul.f32 %v354_v42, %v1701_v29  ;;  %v355_v44 = vmul.f32 %v354_v42, %v1704_v31  ;;  %v467_v45 = vstv %s1140_s9  ;;  %s1172_s23 = sld [smem:[#allocation5 + $0x17]] }
  0x8b   : > { %424 = vrot.lane.b32.xlu0 %v419_v12, %s1463_s17  ;;  %v469_v46 = vmul.f32 %v1711_v34, %v467_v45  ;;  %v468_v47 = vmul.f32 %v1714_v36, %v467_v45  ;;  %v566_v49 = vstv %s1155_s10  ;;  %s1130_s27 = sld [smem:[#allocation5 + $0x20]] }
  0x8c   : > { %v568_v51 = vmul.f32 %v1733_v48, %v566_v49  ;;  %v567_v52 = vmul.f32 %v1736_v50, %v566_v49  ;;  %v580_v53 = vstv %s1156_s11  ;;  %s1145_s14 = sld [smem:[#allocation5 + $0x21]] }
  0x8d   : > { %v582_v54 = vmul.f32 %v1733_v48, %v580_v53  ;;  %v581_v55 = vmul.f32 %v1736_v50, %v580_v53  ;;  %v679_v57 = vstv %s1171_s13  ;;  %s1160_s15 = sld [smem:[#allocation5 + $0x1e]] }
  0x8e   : > { %438 = vrot.lane.b32.xlu1 %v433_v14, %s1462_s16  ;;  %v681_v59 = vmul.f32 %v1747_v56, %v679_v57  ;;  %v680_v60 = vmul.f32 %v1750_v58, %v679_v57  ;;  %v376_v62 = vstv %s1129_s12  ;;  %s1161_s24 = sld [smem:[#allocation5 + $0x22]] }
  0x8f   : > { %436 = vrot.lane.b32.xlu0 %v432_v15, %s1462_s16  ;;  %v378_v1 = vmul.f32 %v376_v62, %v1757_v61  ;;  %v377_v4 = vmul.f32 %v376_v62, %v1760_v63  ;;  %v489_v6 = vstv %s1144_s21  ;;  %s1176_s25 = sld [smem:[#allocation5 + $0x1f]] }
  0x90   : > { %v491_v8 = vmul.f32 %v1767_v5, %v489_v6  ;;  %v490_v9 = vmul.f32 %v1770_v7, %v489_v6  ;;  %v693_v11 = vstv %s1172_s23  ;;  %s1177_s26 = sld [smem:[#allocation5 + $0x23]] }
  0x91   : > { %v695_v12 = vmul.f32 %v1747_v56, %v693_v11  ;;  %v694_v13 = vmul.f32 %v1750_v58, %v693_v11  ;;  %v390_v14 = vstv %s1130_s27  ;;  %s1133_s28 = sld [smem:[#allocation5 + $0x1]] }
  0x92   : > { %537 = vrot.lane.b32.xlu1 %v532_v19, %s1463_s17  ;;  %v392_v15 = vmul.f32 %v390_v14, %v1757_v61  ;;  %v391_v17 = vmul.f32 %v390_v14, %v1760_v63  ;;  %v503_v19 = vstv %s1145_s14  ;;  %s1125_s30 = sld [smem:[#allocation5 + $0xc]] }
  0x93   : > { %535 = vrot.lane.b32.xlu0 %v531_v20, %s1463_s17  ;;  %v505_v20 = vmul.f32 %v1767_v5, %v503_v19  ;;  %v504_v21 = vmul.f32 %v1770_v7, %v503_v19  ;;  %s1138_s7 = sld [smem:[#allocation5 + $0xd]] }
  0x94   : > { %v616_v30 = vstv %s1161_s24  ;;  %s1165_s8 = sld [smem:[#allocation5 + $0x3]] }
  0x95   : > { %s1170_s9 = sld [smem:[#allocation5 + $0xf]] }
  0x96   : > { %551 = vrot.lane.b32.xlu1 %v546_v22, %s1462_s16  ;;  %v1789_v22 = vld [vmem:[%s1632_s18 + $0x2a] sm:$0x3f]  ;;  %s1128_s10 = sld [smem:[#allocation5 + $0x18]] }
  0x97   : > { %549 = vrot.lane.b32.xlu0 %v545_v23, %s1462_s16  ;;  %v602_v23 = vstv %s1160_s15  ;;  %s1143_s11 = sld [smem:[#allocation5 + $0x19]] }
  0x98   : > { %s1159_s13 = sld [smem:[#allocation5 + $0x1a]] }
  0x99   : > { %s1842_s12 = sld [smem:[#allocation6]] }
  0x9a   : > { %650 = vrot.lane.b32.xlu1 %v645_v27, %s1463_s17  ;;  %v604_v27 = vmul.f32 %v1789_v22, %v602_v23  ;;  %s1844_s21 = sld [smem:[#allocation8]] }
  0x9b   : > { %648 = vrot.lane.b32.xlu0 %v644_v28, %s1463_s17  ;;  %v603_v28 = vmul.f32 %v1792_v25, %v602_v23  ;;  %s1846_s23 = sld [smem:[#allocation8 + $0x1]] }
  0x9c   : > { %s1848_s27 = sld [smem:[#allocation8 + $0x2]] }
  0x9d   : > { %s1851_s14 = sld [smem:[#allocation8 + $0x3]] }
  0x9e   : > { %347 = vrot.lane.b32.xlu1 %v342_v32, %s1463_s17  ;;  %v618_v32 = vmul.f32 %v1789_v22, %v616_v30  ;;  %s1854_s15 = sld [smem:[#allocation8 + $0x4]] }
  0x9f   : > { %345 = vrot.lane.b32.xlu0 %v341_v33, %s1463_s17  ;;  %v617_v33 = vmul.f32 %v1792_v25, %v616_v30  ;;  %s1856_s24 = sld [smem:[#allocation8 + $0x5]] }
  0xa0   : > { %s1887_s0 = sld [smem:[#allocation8 + $0x10]] }
  0xa1   : > { %s1892_s1 = sld [smem:[#allocation8 + $0x12]] }
  0xa2   : > { %460 = vrot.lane.b32.xlu1 %v455_v37, %s1463_s17  ;;  %v715_v37 = vstv %s1176_s25  ;;  %s1858_s25 = sld [smem:[#allocation8 + $0x6]] }
  0xa3   : > { %458 = vrot.lane.b32.xlu0 %v454_v38, %s1463_s17  ;;  %v1806_v38 = vld [vmem:[%s1632_s18 + $0x32] sm:$0xff]  ;;  %v717_v39 = vmul.f32 %v1803_v35, %v715_v37  ;;  %s299_s18 = sld [smem:[#allocation5]] }
  0xa4   : > { %s1894_s2 = sld [smem:[#allocation8 + $0x13]] }
  0xa5   : > { %s1900_s3 = sld [smem:[#allocation8 + $0x14]] }
  0xa6   : > { %664 = vrot.lane.b32.xlu1 %v659_v40, %s1462_s16  ;;  %v716_v40 = vmul.f32 %v1806_v38, %v715_v37 }
  0xa7   : > { %662 = vrot.lane.b32.xlu0 %v658_v41, %s1462_s16  ;;  %v729_v41 = vstv %s1177_s26  ;;  %s1175_s26 = sld [smem:[#allocation5 + $0x1b]] }
  0xa8   : > { %v731_v42 = vmul.f32 %v1803_v35, %v729_v41 }
  0xaa   : > { %361 = vrot.lane.b32.xlu1 %v356_v43, %s1462_s16  ;;  %v730_v43 = vmul.f32 %v1806_v38, %v729_v41 }
  0xab   : > { %359 = vrot.lane.b32.xlu0 %v355_v44, %s1462_s16  ;;  %v300_v44 = vstv %s299_s18  ;;  %s1864_s18 = sld [smem:[#allocation8 + $0x7]] }
  0xac   : > { %v301_v45 = vmul.f32 %v300_v44, %v1651_v0 }
  0xae   : > { %474 = vrot.lane.b32.xlu1 %v469_v46, %s1462_s16  ;;  %v413_v46 = vstv %s1133_s28  ;;  %s1866_s28 = sld [smem:[#allocation6 + $0x1]] }
  0xaf   : > { %472 = vrot.lane.b32.xlu0 %v468_v47, %s1462_s16  ;;  %v334_v47 = vstv %s1125_s30  ;;  %v415_v0 = vmul.f32 %v1666_v10, %v413_v46  ;;  %s1868_s30 = sld [smem:[#allocation8 + $0x8]] }
  0xb0   : > { %v336_v6 = vmul.f32 %v334_v47, %v1701_v29 }
  0xb2   : > { %573 = vrot.lane.b32.xlu1 %v568_v51, %s1463_s17 }
  0xb3   : > { %571 = vrot.lane.b32.xlu0 %v567_v52, %s1463_s17  ;;  %v414_v52 = vmul.f32 %v1654_v2, %v413_v46 }
  0xb6   : > { %587 = vrot.lane.b32.xlu1 %v582_v54, %s1462_s16  ;;  %v335_v54 = vmul.f32 %v334_v47, %v1704_v31 }
  0xb7   : > { %585 = vrot.lane.b32.xlu0 %v581_v55, %s1462_s16  ;;  %v302_v55 = vmul.f32 %v300_v44, %v1657_v3 }
  0xba   : > { %686 = vrot.lane.b32.xlu1 %v681_v59, %s1463_s17 }
  0xbb   : > { %684 = vrot.lane.b32.xlu0 %v680_v60, %s1463_s17 }
  0xbe   : > { %383 = vrot.lane.b32.xlu1 %v378_v1, %s1463_s17 }
  0xbf   : > { %381 = vrot.lane.b32.xlu0 %v377_v4, %s1463_s17 }
  0xc2   : > { %496 = vrot.lane.b32.xlu1 %v491_v8, %s1463_s17 }
  0xc3   : > { %494 = vrot.lane.b32.xlu0 %v490_v9, %s1463_s17  ;;  %v447_v9 = vstv %s1138_s7  ;;  %s1870_s7 = sld [smem:[#allocation8 + $0x9]] }
  0xc4   : > { %v449_v3 = vmul.f32 %v1711_v34, %v447_v9 }
  0xc6   : > { %700 = vrot.lane.b32.xlu1 %v695_v12, %s1462_s16 }
  0xc7   : > { %698 = vrot.lane.b32.xlu0 %v694_v13, %s1462_s16 }
  0xca   : > { %397 = vrot.lane.b32.xlu1 %v392_v15, %s1462_s16  ;;  %v448_v15 = vmul.f32 %v1714_v36, %v447_v9 }
  0xcb   : > { %395 = vrot.lane.b32.xlu0 %v391_v17, %s1462_s16 }
  0xce   : > { %510 = vrot.lane.b32.xlu1 %v505_v20, %s1462_s16 }
  0xcf   : > { %508 = vrot.lane.b32.xlu0 %v504_v21, %s1462_s16 }
  0xd2   : > { %609 = vrot.lane.b32.xlu1 %v604_v27, %s1463_s17 }
  0xd3   : > { %607 = vrot.lane.b32.xlu0 %v603_v28, %s1463_s17 }
  0xd6   : > { %623 = vrot.lane.b32.xlu1 %v618_v32, %s1462_s16 }
  0xd7   : > { %621 = vrot.lane.b32.xlu0 %v617_v33, %s1462_s16 }
  0xda   : > { %722 = vrot.lane.b32.xlu1 %v717_v39, %s1463_s17 }
  0xdb   : > { %720 = vrot.lane.b32.xlu0 %v716_v40, %s1463_s17  ;;  %s1154_s17 = sld [smem:[#allocation5 + $0xe]] }
  0xde   : > { %736 = vrot.lane.b32.xlu1 %v731_v42, %s1462_s16 }
  0xdf   : > { %734 = vrot.lane.b32.xlu0 %v730_v43, %s1462_s16  ;;  %s1149_s16 = sld [smem:[#allocation5 + $0x2]] }
  0xe1   : > { %v560_v28 = vstv %s1154_s17  ;;  %s1874_s17 = sld [smem:[#allocation8 + $0xb]] }
  0xe2   : > { %v562_v33 = vmul.f32 %v1733_v48, %v560_v28  ;;  %v561_v36 = vmul.f32 %v1736_v50, %v560_v28 }
  0xe5   : > { %v526_v14 = vstv %s1149_s16  ;;  %s1872_s16 = sld [smem:[#allocation8 + $0xa]] }
  0xe6   : > { %v528_v10 = vmul.f32 %v1677_v16, %v526_v14  ;;  %v527_v23 = vmul.f32 %v1680_v18, %v526_v14  ;;  %v639_v18 = vstv %s1165_s8  ;;  %s1876_s8 = sld [smem:[#allocation8 + $0xc]] }
  0xe7   : > { %v641_v47 = vmul.f32 %v1691_v24, %v639_v18  ;;  %v640_v48 = vmul.f32 %v1694_v26, %v639_v18 }
  0xf4   : > { %v324_v49 = vpop.permute.xlu1 %323 }
  0xf5   : > { %v310_v51 = vpop.permute.xlu0 %309 }
  0xf6   : > { %v315_v53 = vadd.f32 %v310_v51, %v301_v45  ;;  %v673_v51 = vstv %s1170_s9  ;;  %s1878_s9 = sld [smem:[#allocation8 + $0xd]] }
  0xf8   : > { %v329_v57 = vadd.f32 %v324_v49, %v315_v53  ;;  %v423_v59 = vpop.permute.xlu1 %422  ;;  %v675_v53 = vmul.f32 %v1747_v56, %v673_v51 }
  0xf9   : > { %v428_v60 = vadd.f32 %v423_v59, %v414_v52  ;;  %v312_v62 = vpop.permute.xlu0 %311  ;;  %v370_v59 = vstv %s1128_s10  ;;  %s1880_s10 = sld [smem:[#allocation8 + $0xe]] }
  0xfa   : > { %v337_v1 = vadd.f32 %v335_v54, %v329_v57  ;;  %v316_v4 = vadd.f32 %v312_v62, %v302_v55  ;;  %v674_v57 = vmul.f32 %v1750_v58, %v673_v51  ;;  %v372_v24 = vmul.f32 %v370_v59, %v1757_v61 }
  0xfc   : > { %v326_v8 = vpop.permute.xlu1 %325 }
  0xfd   : > { %v330_v2 = vadd.f32 %v326_v8, %v316_v4  ;;  %v425_v11 = vpop.permute.xlu0 %424 }
  0xfe   : > { %v429_v12 = vadd.f32 %v425_v11, %v415_v0  ;;  %v483_v11 = vstv %s1143_s11  ;;  %s1882_s11 = sld [smem:[#allocation8 + $0xf]] }
  0xff   : > { %v338_v31 = vadd.f32 %v336_v6, %v330_v2  ;;  %v371_v2 = vmul.f32 %v370_v59, %v1760_v63  ;;  %v485_v14 = vmul.f32 %v1767_v5, %v483_v11  ;;  %v843_v59 = vstv %s1851_s14  ;;  %s1946_s14 = sld [smem:[#allocation8 + $0x18]] }
 0x100   : > { %v439_v13 = vpop.permute.xlu1 %438 }
 0x101   : > { %v443_v17 = vadd.f32 %v439_v13, %v429_v12  ;;  %v437_v19 = vpop.permute.xlu0 %436 }
 0x102   : > { %v442_v20 = vadd.f32 %v437_v19, %v428_v60  ;;  %v484_v19 = vmul.f32 %v1770_v7, %v483_v11 }
 0x103   : > { %v451_v21 = vadd.f32 %v449_v3, %v443_v17 }
 0x104   : > { %v538_v29 = vpop.permute.xlu1 %537  ;;  %v450_v27 = vadd.f32 %v448_v15, %v442_v20 }
 0x105   : > { %v536_v30 = vpop.permute.xlu0 %535  ;;  %v542_v32 = vadd.f32 %v538_v29, %v528_v10 }
 0x106   : > { %v541_v34 = vadd.f32 %v536_v30, %v527_v23  ;;  %v596_v23 = vstv %s1159_s13  ;;  %s1884_s13 = sld [smem:[#allocation6 + $0x2]] }
 0x107   : > { %v598_v7 = vmul.f32 %v1789_v22, %v596_v23  ;;  %v597_v30 = vmul.f32 %v1792_v25, %v596_v23 }
 0x108   : > { %v552_v37 = vpop.permute.xlu1 %551 }
 0x109   : > { %v556_v39 = vadd.f32 %v552_v37, %v542_v32  ;;  %v550_v40 = vpop.permute.xlu0 %549 }
 0x10a   : > { %v555_v41 = vadd.f32 %v550_v40, %v541_v34 }
 0x10b   : > { %v564_v42 = vadd.f32 %v562_v33, %v556_v39 }
 0x10c   : > { %v651_v16 = vpop.permute.xlu1 %650  ;;  %v563_v43 = vadd.f32 %v561_v36, %v555_v41 }
 0x10d   : > { %v649_v44 = vpop.permute.xlu0 %648  ;;  %v655_v52 = vadd.f32 %v651_v16, %v641_v47 }
 0x10e   : > { %v654_v54 = vadd.f32 %v649_v44, %v640_v48 }
 0x110   : > { %v348_v45 = vpop.permute.xlu1 %347 }
 0x111   : > { %v346_v46 = vpop.permute.xlu0 %345  ;;  %v352_v0 = vadd.f32 %v348_v45, %v338_v31 }
 0x112   : > { %v351_v26 = vadd.f32 %v346_v46, %v337_v1 }
 0x114   : > { %v461_v49 = vpop.permute.xlu1 %460 }
 0x115   : > { %v459_v50 = vpop.permute.xlu0 %458  ;;  %v465_v13 = vadd.f32 %v461_v49, %v451_v21 }
 0x116   : > { %v464_v15 = vadd.f32 %v459_v50, %v450_v27 }
 0x118   : > { %v665_v55 = vpop.permute.xlu1 %664 }
 0x119   : > { %v669_v60 = vadd.f32 %v665_v55, %v655_v52  ;;  %v663_v62 = vpop.permute.xlu0 %662  ;;  %v749_v52 = vstv %s1844_s21  ;;  %v781_v55 = vstv %s1846_s23  ;;  %s1932_s21 = sld [smem:[#allocation8 + $0x16]] }
 0x11a   : > { %v668_v4 = vadd.f32 %v663_v62, %v654_v54  ;;  %s1934_s23 = sld [smem:[#allocation8 + $0x17]] }
 0x11b   : > { %v677_v6 = vadd.f32 %v675_v53, %v669_v60 }
 0x11c   : > { %v362_v8 = vpop.permute.xlu1 %361  ;;  %v676_v9 = vadd.f32 %v674_v57, %v668_v4  ;;  %v812_v57 = vstv %s1848_s27  ;;  %v874_v4 = vstv %s1854_s15  ;;  %s1936_s27 = sld [smem:[#allocation6 + $0x3]] }
 0x11d   : > { %v366_v56 = vadd.f32 %v362_v8, %v352_v0  ;;  %v360_v12 = vpop.permute.xlu0 %359  ;;  %v905_v0 = vstv %s1856_s24  ;;  %s1956_s15 = sld [smem:[#allocation9]] }
 0x11e   : > { %v365_v3 = vadd.f32 %v360_v12, %v351_v26  ;;  %v967_v26 = vstv %s1864_s18  ;;  %v816_v12 = vstv %s1872_s16  ;;  %s1966_s24 = sld [smem:[#allocation8 + $0x19]] }
 0x11f   : > { %v374_v58 = vadd.f32 %v372_v24, %v366_v56  ;;  %v785_v56 = vstv %s1870_s7  ;;  %s1978_s18 = sld [smem:[#allocation8 + $0x1a]] }
 0x120   : > { %v475_v17 = vpop.permute.xlu1 %474  ;;  %v373_v31 = vadd.f32 %v371_v2, %v365_v3  ;;  %v753_v2 = vstv %s1868_s30  ;;  %v847_v3 = vstv %s1874_s17  ;;  %s1990_s30 = sld [smem:[#allocation8 + $0x1b]] }
 0x121   : > { %v479_v61 = vadd.f32 %v475_v17, %v465_v13  ;;  %v473_v1 = vpop.permute.xlu0 %472  ;;  %v878_v17 = vstv %s1876_s8  ;;  %s1992_s7 = sld [smem:[#allocation9 + $0x3]] }
 0x122   : > { %v478_v20 = vadd.f32 %v473_v1, %v464_v15  ;;  %v971_v1 = vstv %s1882_s11  ;;  %s2000_s16 = sld [smem:[#allocation8 + $0x1c]] }
 0x123   : > { %v1838_v10 = vadd.f32 %v485_v14, %v479_v61  ;;  %v940_v61 = vstv %s1880_s10  ;;  %s2006_s17 = sld [smem:[#allocation9 + $0x4]] }
 0x124   : > { %v574_v63 = vpop.permute.xlu1 %573  ;;  %v1840_v29 = vadd.f32 %v484_v19, %v478_v20  ;;  %v909_v19 = vstv %s1878_s9  ;;  %v630_v20 = vstv %s1884_s13  ;;  %s2011_s8 = sld [smem:[#allocation8 + $0x1d]] }
 0x125   : > { %v572_v21 = vpop.permute.xlu0 %571  ;;  %v578_v5 = vadd.f32 %v574_v63, %v564_v42  ;;  %v709_v42 = vstv %s1175_s26  ;;  %s1890_s26 = sld [smem:[#allocation8 + $0x11]] }
 0x126   : > { %v577_v27 = vadd.f32 %v572_v21, %v563_v43  ;;  %v711_v44 = vmul.f32 %v1803_v35, %v709_v42  ;;  %v710_v46 = vmul.f32 %v1806_v38, %v709_v42  ;;  %v404_v38 = vstv %s1842_s12  ;;  %s1928_s12 = sld [smem:[#allocation8 + $0x15]] }
 0x127   : > { %s2014_s9 = sld [smem:[#allocation9 + $0x5]] }
 0x128   : > { %v588_v28 = vpop.permute.xlu1 %587  ;;  %s2024_s10 = sld [smem:[#allocation8 + $0x1e]] }
 0x129   : > { %v592_v32 = vadd.f32 %v588_v28, %v578_v5  ;;  %v586_v33 = vpop.permute.xlu0 %585  ;;  %v759_v5 = vstv %s1887_s0  ;;  %v822_v28 = vstv %s1892_s1  ;;  %s2028_s11 = sld [smem:[#allocation9 + $0x6]]  ;;  %s1234_s0 = sshll.u32 %s2212_s22, 7 }
 0x12a   : > { %v591_v34 = vadd.f32 %v586_v33, %v577_v27  ;;  %s2034_s13 = sld [smem:[#allocation8 + $0x1f]] }
 0x12b   : > { %v1860_v37 = vadd.f32 %v598_v7, %v592_v32  ;;  %v791_v27 = vstv %s1890_s26 }
 0x12c   : > { %v687_v36 = vpop.permute.xlu1 %686  ;;  %v1862_v39 = vadd.f32 %v597_v30, %v591_v34  ;;  %v853_v30 = vstv %s1894_s2 }
 0x12d   : > { %v685_v22 = vpop.permute.xlu0 %684  ;;  %v691_v43 = vadd.f32 %v687_v36, %v677_v6  ;;  %v936_v6 = vstv %s1858_s25  ;;  %s1968_s25 = sld [smem:[#allocation9 + $0x1]] }
 0x12e   : > { %v690_v18 = vadd.f32 %v685_v22, %v676_v9  ;;  %v517_v9 = vstv %s1866_s28  ;;  %s1988_s28 = sld [smem:[#allocation9 + $0x2]] }
 0x130   : > { %v384_v25 = vpop.permute.xlu1 %383 }
 0x131   : > { %v382_v40 = vpop.permute.xlu0 %381  ;;  %v388_v51 = vadd.f32 %v384_v25, %v374_v58 }
 0x132   : > { %v387_v50 = vadd.f32 %v382_v40, %v373_v31 }
 0x134   : > { %v497_v41 = vpop.permute.xlu1 %496 }
 0x135   : > { %v495_v16 = vpop.permute.xlu0 %494  ;;  %v501_v58 = vadd.f32 %v497_v41, %v1838_v10  ;;  %v884_v10 = vstv %s1900_s3  ;;  %s2095_s3 = scalar_lea.vmem %s2183_s5, %s1234_s0 }
 0x136   : > { %v500_v14 = vadd.f32 %v495_v16, %v1840_v29 }
 0x138   : > { %v701_v45 = vpop.permute.xlu1 %700 }
 0x139   : > { %v705_v47 = vadd.f32 %v701_v45, %v691_v43  ;;  %v699_v48 = vpop.permute.xlu0 %698 }
 0x13a   : > { %v704_v49 = vadd.f32 %v699_v48, %v690_v18 }
 0x13b   : > { %v1896_v35 = vadd.f32 %v711_v44, %v705_v47 }
 0x13c   : > { %v398_v53 = vpop.permute.xlu1 %397  ;;  %v1902_v54 = vadd.f32 %v710_v46, %v704_v49 }
 0x13d   : > { %v402_v60 = vadd.f32 %v398_v53, %v388_v51  ;;  %v396_v62 = vpop.permute.xlu0 %395 }
 0x13e   : > { %v401_v24 = vadd.f32 %v396_v62, %v387_v50 }
 0x13f   : > { %v406_v8 = vadd.f32 %v404_v38, %v402_v60 }
 0x140   : > { %v405_v11 = vadd.f32 %v404_v38, %v401_v24  ;;  %v511_v13 = vpop.permute.xlu1 %510 }
 0x141   : > { %v408_v15 = vmax.f32 %v406_v8, 0.0  ;;  %v509_v31 = vpop.permute.xlu0 %508  ;;  %v515_v23 = vadd.f32 %v511_v13, %v501_v58 }
 0x142   : > { %v407_v63 = vmax.f32 %v405_v11, 0.0  ;;  %v514_v21 = vadd.f32 %v509_v31, %v500_v14 }
 0x143   : > { %v751_v32 = vmul.f32 %v749_v52, %v408_v15  ;;  %v783_v33 = vmul.f32 %v781_v55, %v408_v15  ;;  %v814_v29 = vmul.f32 %v812_v57, %v408_v15  ;;  %v845_v34 = vmul.f32 %v843_v59, %v408_v15 }
 0x144   : > { %v610_v7 = vpop.permute.xlu1 %609  ;;  %v876_v22 = vmul.f32 %v874_v4, %v408_v15  ;;  %v907_v25 = vmul.f32 %v905_v0, %v408_v15  ;;  %v938_v40 = vmul.f32 %v936_v6, %v408_v15  ;;  %v969_v41 = vmul.f32 %v967_v26, %v408_v15 }
 0x145   : > { %v608_v36 = vpop.permute.xlu0 %607  ;;  %v750_v42 = vmul.f32 %v749_v52, %v407_v63  ;;  %v782_v16 = vmul.f32 %v781_v55, %v407_v63  ;;  %v519_v43 = vadd.f32 %v517_v9, %v515_v23  ;;  %v518_v44 = vadd.f32 %v517_v9, %v514_v21 }
 0x146   : > { %v813_v18 = vmul.f32 %v812_v57, %v407_v63  ;;  %v844_v45 = vmul.f32 %v843_v59, %v407_v63  ;;  %v614_v46 = vadd.f32 %v610_v7, %v1860_v37  ;;  %v613_v47 = vadd.f32 %v608_v36, %v1862_v39 }
 0x147   : > { %v875_v49 = vmul.f32 %v874_v4, %v407_v63  ;;  %v906_v51 = vmul.f32 %v905_v0, %v407_v63  ;;  %v937_v50 = vmul.f32 %v936_v6, %v407_v63  ;;  %v521_v38 = vmax.f32 %v519_v43, 0.0 }
 0x148   : > { %v624_v48 = vpop.permute.xlu1 %623  ;;  %v968_v37 = vmul.f32 %v967_v26, %v407_v63  ;;  %v520_v53 = vmax.f32 %v518_v44, 0.0  ;;  %v977_v43 = vstv %s1934_s23 }
 0x149   : > { %v622_v52 = vpop.permute.xlu0 %621  ;;  %v628_v55 = vadd.f32 %v624_v48, %v614_v46  ;;  %v755_v57 = vmul.f32 %v753_v2, %v521_v38  ;;  %v787_v59 = vmul.f32 %v785_v56, %v521_v38  ;;  %v818_v60 = vmul.f32 %v816_v12, %v521_v38 }
 0x14a   : > { %v627_v39 = vadd.f32 %v622_v52, %v613_v47  ;;  %v849_v62 = vmul.f32 %v847_v3, %v521_v38  ;;  %v880_v4 = vmul.f32 %v878_v17, %v521_v38  ;;  %v911_v0 = vmul.f32 %v909_v19, %v521_v38 }
 0x14b   : > { %v942_v6 = vmul.f32 %v940_v61, %v521_v38  ;;  %v973_v24 = vmul.f32 %v971_v1, %v521_v38  ;;  %v1958_v26 = vadd.f32 %v755_v57, %v751_v32  ;;  %v1960_v8 = vadd.f32 %v787_v59, %v783_v33 }
 0x14c   : > { %v1962_v9 = vadd.f32 %v818_v60, %v814_v29  ;;  %v1964_v11 = vadd.f32 %v849_v62, %v845_v34  ;;  %v723_v13 = vpop.permute.xlu1 %722  ;;  %v882_v14 = vadd.f32 %v880_v4, %v876_v22  ;;  %v913_v15 = vadd.f32 %v911_v0, %v907_v25 }
 0x14d   : > { %v721_v58 = vpop.permute.xlu0 %720  ;;  %v944_v31 = vadd.f32 %v942_v6, %v938_v40  ;;  %v975_v63 = vadd.f32 %v973_v24, %v969_v41  ;;  %v754_v23 = vmul.f32 %v753_v2, %v520_v53  ;;  %v786_v21 = vmul.f32 %v785_v56, %v520_v53 }
 0x14e   : > { %v817_v7 = vmul.f32 %v816_v12, %v520_v53  ;;  %v848_v32 = vmul.f32 %v847_v3, %v520_v53  ;;  %v879_v33 = vmul.f32 %v878_v17, %v520_v53  ;;  %v910_v29 = vmul.f32 %v909_v19, %v520_v53 }
 0x14f   : > { %v941_v34 = vmul.f32 %v940_v61, %v520_v53  ;;  %v972_v2 = vmul.f32 %v971_v1, %v520_v53  ;;  %v756_v56 = vadd.f32 %v754_v23, %v750_v42  ;;  %v788_v12 = vadd.f32 %v786_v21, %v782_v16 }
 0x150   : > { %v819_v3 = vadd.f32 %v817_v7, %v813_v18  ;;  %v850_v36 = vadd.f32 %v848_v32, %v844_v45  ;;  %v881_v17 = vadd.f32 %v879_v33, %v875_v49  ;;  %v912_v22 = vadd.f32 %v910_v29, %v906_v51  ;;  %v737_v42 = vpop.permute.xlu1 %736 }
 0x151   : > { %v943_v25 = vadd.f32 %v941_v34, %v937_v50  ;;  %v974_v19 = vadd.f32 %v972_v2, %v968_v37  ;;  %v915_v61 = vstv %s1928_s12  ;;  %v946_v1 = vstv %s1932_s21  ;;  %v735_v16 = vpop.permute.xlu0 %734  ;;  %s2036_s12 = sld [smem:[#allocation9 + $0x7]] }
 0x152   : > { %v632_v40 = vadd.f32 %v630_v20, %v628_v55  ;;  %v631_v41 = vadd.f32 %v630_v20, %v627_v39  ;;  %v727_v44 = vadd.f32 %v723_v13, %v1896_v35  ;;  %v726_v18 = vadd.f32 %v721_v58, %v1902_v54 }
 0x153   : > { %v743_v45 = vstv %s1936_s27  ;;  %v765_v47 = vstv %s1946_s14  ;;  %v771_v20 = vstv %s1956_s15  ;;  %v797_v48 = vstv %s1966_s24 }
 0x154   : > { %v634_v46 = vmax.f32 %v632_v40, 0.0  ;;  %v633_v49 = vmax.f32 %v631_v41, 0.0  ;;  %v803_v51 = vstv %s1968_s25  ;;  %v741_v50 = vadd.f32 %v737_v42, %v727_v44 }
 0x155   : > { %v740_v35 = vadd.f32 %v735_v16, %v726_v18  ;;  %v828_v7 = vstv %s1978_s18  ;;  %v834_v32 = vstv %s1988_s28  ;;  %v859_v34 = vstv %s1990_s30 }
 0x156   : > { %v761_v38 = vmul.f32 %v759_v5, %v634_v46  ;;  %v793_v54 = vmul.f32 %v791_v27, %v634_v46  ;;  %v824_v52 = vmul.f32 %v822_v28, %v634_v46  ;;  %v855_v37 = vmul.f32 %v853_v30, %v634_v46 }
 0x157   : > { %v886_v53 = vmul.f32 %v884_v10, %v634_v46  ;;  %v917_v55 = vmul.f32 %v915_v61, %v634_v46  ;;  %v948_v39 = vmul.f32 %v946_v1, %v634_v46  ;;  %v979_v57 = vmul.f32 %v977_v43, %v634_v46 }
 0x158   : > { %v763_v59 = vadd.f32 %v761_v38, %v1958_v26  ;;  %v795_v60 = vadd.f32 %v793_v54, %v1960_v8  ;;  %v826_v62 = vadd.f32 %v824_v52, %v1962_v9  ;;  %v857_v4 = vadd.f32 %v855_v37, %v1964_v11 }
 0x159   : > { %v888_v0 = vadd.f32 %v886_v53, %v882_v14  ;;  %v919_v6 = vadd.f32 %v917_v55, %v913_v15  ;;  %v950_v24 = vadd.f32 %v948_v39, %v944_v31  ;;  %v981_v13 = vadd.f32 %v979_v57, %v975_v63 }
 0x15a   : > { %v760_v58 = vmul.f32 %v759_v5, %v633_v49  ;;  %v792_v23 = vmul.f32 %v791_v27, %v633_v49  ;;  %v823_v26 = vmul.f32 %v822_v28, %v633_v49  ;;  %v854_v8 = vmul.f32 %v853_v30, %v633_v49 }
 0x15b   : > { %v885_v9 = vmul.f32 %v884_v10, %v633_v49  ;;  %v916_v11 = vmul.f32 %v915_v61, %v633_v49  ;;  %v947_v14 = vmul.f32 %v946_v1, %v633_v49  ;;  %v978_v15 = vmul.f32 %v977_v43, %v633_v49 }
 0x15c   : > { %v2048_v31 = vadd.f32 %v760_v58, %v756_v56  ;;  %v2050_v63 = vadd.f32 %v792_v23, %v788_v12  ;;  %v2052_v5 = vadd.f32 %v823_v26, %v819_v3  ;;  %v2054_v27 = vadd.f32 %v854_v8, %v850_v36 }
 0x15d   : > { %v2057_v28 = vadd.f32 %v885_v9, %v881_v17  ;;  %v2059_v30 = vadd.f32 %v916_v11, %v912_v22  ;;  %v2061_v10 = vadd.f32 %v947_v14, %v943_v25  ;;  %v2063_v21 = vadd.f32 %v978_v15, %v974_v19 }
 0x15e   : > { %v745_v33 = vadd.f32 %v743_v45, %v741_v50  ;;  %v744_v29 = vadd.f32 %v743_v45, %v740_v35  ;;  %v865_v2 = vstv %s1992_s7  ;;  %v890_v56 = vstv %s2000_s16 }
 0x15f   : > { %v896_v12 = vstv %s2006_s17  ;;  %v921_v3 = vstv %s2011_s8  ;;  %v952_v36 = vstv %s2024_s10  ;;  %v983_v17 = vstv %s2034_s13 }
 0x160   : > { %v747_v22 = vmax.f32 %v745_v33, 0.0  ;;  %v927_v25 = vstv %s2014_s9  ;;  %v958_v19 = vstv %s2028_s11  ;;  %v989_v61 = vstv %s2036_s12 }
 0x161   : > { %v746_v1 = vmax.f32 %v744_v29, 0.0 }
 0x162   : > { %v767_v40 = vmul.f32 %v765_v47, %v747_v22  ;;  %v799_v41 = vmul.f32 %v797_v48, %v747_v22  ;;  %v830_v42 = vmul.f32 %v828_v7, %v747_v22  ;;  %v861_v16 = vmul.f32 %v859_v34, %v747_v22 }
 0x163   : > { %v892_v43 = vmul.f32 %v890_v56, %v747_v22  ;;  %v923_v44 = vmul.f32 %v921_v3, %v747_v22  ;;  %v954_v18 = vmul.f32 %v952_v36, %v747_v22  ;;  %v985_v45 = vmul.f32 %v983_v17, %v747_v22 }
 0x164   : > { %v769_v46 = vadd.f32 %v767_v40, %v763_v59  ;;  %v801_v49 = vadd.f32 %v799_v41, %v795_v60  ;;  %v832_v50 = vadd.f32 %v830_v42, %v826_v62  ;;  %v863_v35 = vadd.f32 %v861_v16, %v857_v4 }
 0x165   : > { %v894_v38 = vadd.f32 %v892_v43, %v888_v0  ;;  %v925_v54 = vadd.f32 %v923_v44, %v919_v6  ;;  %v956_v52 = vadd.f32 %v954_v18, %v950_v24  ;;  %v987_v37 = vadd.f32 %v985_v45, %v981_v13 }
 0x166   : > { %v773_v53 = vadd.f32 %v771_v20, %v769_v46  ;;  %v805_v55 = vadd.f32 %v803_v51, %v801_v49  ;;  %v836_v39 = vadd.f32 %v834_v32, %v832_v50  ;;  %v867_v57 = vadd.f32 %v865_v2, %v863_v35 }
 0x167   : > { %v898_v59 = vadd.f32 %v896_v12, %v894_v38  ;;  %v929_v60 = vadd.f32 %v927_v25, %v925_v54  ;;  %v960_v62 = vadd.f32 %v958_v19, %v956_v52  ;;  %v991_v4 = vadd.f32 %v989_v61, %v987_v37 }
 0x168   : > { %v775_v0 = vmax.f32 %v773_v53, 0.0  ;;  %v807_v6 = vmax.f32 %v805_v55, 0.0  ;;  %v838_v24 = vmax.f32 %v836_v39, 0.0  ;;  %v869_v13 = vmax.f32 %v867_v57, 0.0 }
 0x169   : > { %v900_v58 = vmax.f32 %v898_v59, 0.0  ;;  %v931_v23 = vmax.f32 %v929_v60, 0.0  ;;  %v962_v26 = vmax.f32 %v960_v62, 0.0  ;;  %v993_v8 = vmax.f32 %v991_v4, 0.0 }
 0x16a   : > { %779 = vst.msk [vmem:[%s2095_s3 + $0x8] sm:$0x3f] %vm778_vm0, %v775_v0  ;;  %1188 = vst.msk [vmem:[%s2095_s3 + $0x18] sm:$0x3f] %vm778_vm0, %v807_v6  ;;  %v766_v9 = vmul.f32 %v765_v47, %v746_v1  ;;  %v798_v11 = vmul.f32 %v797_v48, %v746_v1  ;;  %v829_v14 = vmul.f32 %v828_v7, %v746_v1 }
 0x16b   : > { %1195 = vst.msk [vmem:[%s2095_s3 + $0x28] sm:$0x3f] %vm778_vm0, %v838_v24  ;;  %1202 = vst.msk [vmem:[%s2095_s3 + $0x38] sm:$0x3f] %vm778_vm0, %v869_v13  ;;  %v860_v15 = vmul.f32 %v859_v34, %v746_v1  ;;  %v891_v33 = vmul.f32 %v890_v56, %v746_v1  ;;  %v922_v29 = vmul.f32 %v921_v3, %v746_v1 }
 0x16c   : > { %1209 = vst.msk [vmem:[%s2095_s3 + $0x48] sm:$0x3f] %vm778_vm0, %v900_v58  ;;  %1216 = vst.msk [vmem:[%s2095_s3 + $0x58] sm:$0x3f] %vm778_vm0, %v931_v23  ;;  %v953_v47 = vmul.f32 %v952_v36, %v746_v1  ;;  %v984_v48 = vmul.f32 %v983_v17, %v746_v1  ;;  %v768_v7 = vadd.f32 %v766_v9, %v2048_v31 }
 0x16d   : > { %1223 = vst.msk [vmem:[%s2095_s3 + $0x68] sm:$0x3f] %vm778_vm0, %v962_v26  ;;  %1230 = vst.msk [vmem:[%s2095_s3 + $0x78] sm:$0x3f] %vm778_vm0, %v993_v8  ;;  %v800_v34 = vadd.f32 %v798_v11, %v2050_v63  ;;  %v831_v22 = vadd.f32 %v829_v14, %v2052_v5  ;;  %v862_v40 = vadd.f32 %v860_v15, %v2054_v27 }
 0x16e   : > { %v893_v41 = vadd.f32 %v891_v33, %v2057_v28  ;;  %v924_v42 = vadd.f32 %v922_v29, %v2059_v30  ;;  %v955_v56 = vadd.f32 %v953_v47, %v2061_v10  ;;  %v986_v3 = vadd.f32 %v984_v48, %v2063_v21 }
 0x16f   : > { %v772_v36 = vadd.f32 %v771_v20, %v768_v7  ;;  %v804_v17 = vadd.f32 %v803_v51, %v800_v34  ;;  %v835_v31 = vadd.f32 %v834_v32, %v831_v22  ;;  %v866_v63 = vadd.f32 %v865_v2, %v862_v40 }
 0x170   : > { %v897_v5 = vadd.f32 %v896_v12, %v893_v41  ;;  %v928_v27 = vadd.f32 %v927_v25, %v924_v42  ;;  %v959_v28 = vadd.f32 %v958_v19, %v955_v56  ;;  %v990_v20 = vadd.f32 %v989_v61, %v986_v3 }
 0x171   : > { %v774_v51 = vmax.f32 %v772_v36, 0.0  ;;  %v806_v30 = vmax.f32 %v804_v17, 0.0  ;;  %v837_v10 = vmax.f32 %v835_v31, 0.0  ;;  %v868_v21 = vmax.f32 %v866_v63, 0.0 }
 0x172   : > { %v899_v32 = vmax.f32 %v897_v5, 0.0  ;;  %v930_v1 = vmax.f32 %v928_v27, 0.0  ;;  %v961_v2 = vmax.f32 %v959_v28, 0.0  ;;  %v992_v16 = vmax.f32 %v990_v20, 0.0 }
 0x173   : > { %777 = vst.msk [vmem:[%s2095_s3] sm:$0xff] %vm776_vm1, %v774_v51  ;;  %1187 = vst.msk [vmem:[%s2095_s3 + $0x10] sm:$0xff] %vm776_vm1, %v806_v30 }
 0x174   : > { %1194 = vst.msk [vmem:[%s2095_s3 + $0x20] sm:$0xff] %vm776_vm1, %v837_v10  ;;  %1201 = vst.msk [vmem:[%s2095_s3 + $0x30] sm:$0xff] %vm776_vm1, %v868_v21 }
 0x175   : > { %1208 = vst.msk [vmem:[%s2095_s3 + $0x40] sm:$0xff] %vm776_vm1, %v899_v32  ;;  %1215 = vst.msk [vmem:[%s2095_s3 + $0x50] sm:$0xff] %vm776_vm1, %v930_v1 }
 0x176   : > { %1222 = vst.msk [vmem:[%s2095_s3 + $0x60] sm:$0xff] %vm776_vm1, %v961_v2  ;;  %1229 = vst.msk [vmem:[%s2095_s3 + $0x70] sm:$0xff] %vm776_vm1, %v992_v16 }
 0x177 PF: > { %p18_p0 = scmp.ge.s32.totalorder %s1583_s29, 4   ;;  %s2207_s18 = smov %s1445_s19 }
 0x178   : > { %s2208_s19 = smov %s1449_s20  ;;  %s2209_s20 = smov %s1592_s6 }
 0x179   : > { %s2210_s21 = smov %s1583_s29  ;;  %20 = sbr.rel (!%p18_p0) target bundleno = 11 (0xb), region = 107 }
 0x17e   :  { %1018 = vsyncpa [#allocation3], 1 }
 0x17f   :  { %1020 = vsyncpa [#allocation3 + $0x1], 1 }
 0x180   :  { %1021 = vsyncpa [#allocation4], 1 }
 0x181   :  { %1023 = vsyncpa [#allocation4 + $0x1], 1 }
 0x182   :  { %1024 = vsyncpa [#allocation7], 1 }
 0x183   :  { %1025 = vsyncpa [#allocation10], 1 }

</bundles_post_ra>
